<compile_context>
chip_gen: v7x
topology: tpu7x:2x2x1
jax: 0.10.0
libtpu: 0.0.40
codegen_flags: <defaults>
</compile_context>

<pallas_src>
import functools

import jax
import jax.numpy as jnp
from jax.experimental import pallas as pl
from jax.experimental.pallas import tpu as pltpu


# ---------------------------------------------------------------------------
# Kernel body
# ---------------------------------------------------------------------------
def _adapter_kernel(q_ref, x_ref,
                    wq_ref, bq_ref,
                    wkv_ref, bkv_ref,
                    wo_ref, bo_ref,
                    out_ref, *, residual: bool, scale: float,
                    approx_recip: bool):
    Bt, Nq, Hp = q_ref.shape
    _, Nx, _ = x_ref.shape
    mm_dtype = q_ref.dtype          # bf16 (fast path) or f32 (exact path)

    # Flatten batch into rows: taller LHS tiles for the MXU.
    q2 = q_ref[...].reshape(Bt * Nq, Hp)        # (Bt*Nq, Hp)
    x2 = x_ref[...].reshape(Bt * Nx, Hp)        # (Bt*Nx, Hp)

    # Projections (f32 accumulation on the MXU). K/V fused into one wide matmul.
    Q2 = jnp.dot(q2, wq_ref[...], preferred_element_type=jnp.float32) + bq_ref[...]
    KV2 = jnp.dot(x2, wkv_ref[...], preferred_element_type=jnp.float32) + bkv_ref[...]

    Q = Q2.reshape(Bt, Nq, Hp)                          # f32, kept for skip add
    K = KV2[:, :Hp].reshape(Bt, Nx, Hp).astype(mm_dtype)
    V = KV2[:, Hp:].reshape(Bt, Nx, Hp).astype(mm_dtype)

    # Fold 1/sqrt(H) into the small Q cast (avoids a VPU pass over the much
    # larger (Nq, Nx) score tensor and a duplicate f32/bf16 Q live range).
    Qs = (Q * scale).astype(mm_dtype)

    # Scores: contract the shared hidden axis directly (NT matmul, no explicit
    # K transpose).
    scores = jnp.einsum("bqd,bkd->bqk", Qs, K,
                        preferred_element_type=jnp.float32)   # (Bt, Nq, Nx) f32

    # Softmax over keys (f32).
    m = jnp.max(scores, axis=-1, keepdims=True)
    e = jnp.exp(scores - m)
    denom = jnp.sum(e, axis=-1, keepdims=True)
    if approx_recip:
        P = e * pl.reciprocal(denom, approx=True)   # EUP slot, bf16 path only
    else:
        P = e / denom                               # exact on the f32 path

    # TODO(synk): flash-style online softmax over an Nx grid axis before
    # scaling Nx into the thousands (keeps working set O(Nq*Hp)).
    attn = jnp.einsum("bqk,bkd->bqd", P.astype(mm_dtype), V,
                      preferred_element_type=jnp.float32)     # (Bt, Nq, Hp) f32

    out = Q + attn                                            # query skip, f32
    out2 = out.reshape(Bt * Nq, Hp)

    proj = jnp.dot(out2.astype(mm_dtype), wo_ref[...],
                   preferred_element_type=jnp.float32) + bo_ref[...]
    proj = jnp.maximum(proj, 0.0)

    res = out2 + proj if residual else proj
    out_ref[...] = res.reshape(Bt, Nq, Hp).astype(out_ref.dtype)


# ---------------------------------------------------------------------------
# Host-side helpers
# ---------------------------------------------------------------------------
def _vmem_budget_bytes() -> int:
    """~72% of physical VMEM (leaves compiler scratch / spill headroom).
    Falls back to a conservative 64 MiB if the query is unavailable."""
    cap = None
    try:
        cap = getattr(pltpu.get_tpu_info(), "vmem_capacity_bytes", None)
    except Exception:
        cap = None
    if not cap:
        cap = 64 * 1024 * 1024
    return int(0.72 * cap)


def _pick_batch_block(B, Nq, Nx, Hp, mm_itm, out_itm, weight_bytes, budget):
    """Largest divisor of B whose per-step working set fits the VMEM budget.
    Collapses to a single grid step (Bt=B) whenever possible so the MXU gets
    tall LHS tiles and the ~0.35us/step overhead is paid once."""
    def step_bytes(bt):
        rows_q = bt * Nq
        rows_x = bt * Nx
        # double-buffered activation blocks (q, x inputs + output)
        act = 2 * (rows_q * Hp * mm_itm + rows_x * Hp * mm_itm
                   + rows_q * Hp * out_itm)
        # f32 intermediates alive at once: Q, K, V, scores/e, attn/out (approx)
        work = 4 * (rows_q * Hp + 2 * rows_x * Hp
                    + 2 * rows_q * Nx + 2 * rows_q * Hp)
        return act + work

    fitting = [bt for bt in range(1, B + 1)
               if B % bt == 0 and weight_bytes + step_bytes(bt) <= budget]
    return max(fitting) if fitting else 1


def prepare_params(params, *, use_bf16: bool = True):
    """One-time parameter prep (do this OUTSIDE the serving loop):
    cast to the matmul dtype, zero-pad the hidden dim to a lane-dense multiple
    of 128, and fuse the K/V projections into one (Hp, 2*Hp) matmul.
    Zero padding is semantics-preserving; the softmax scale uses original H."""
    H = params["wq"].shape[0]
    Hp = ((H + 127) // 128) * 128
    pad = Hp - H
    mm_dtype = jnp.bfloat16 if use_bf16 else jnp.float32

    def pad_w(w):
        w = w.astype(mm_dtype)
        return jnp.pad(w, ((0, pad), (0, pad))) if pad else w

    def pad_b(b):
        b = jnp.asarray(b, jnp.float32).reshape(1, H)
        return jnp.pad(b, ((0, 0), (0, pad))) if pad else b

    wk, wv = pad_w(params["wk"]), pad_w(params["wv"])
    bk, bv = pad_b(params["bk"]), pad_b(params["bv"])

    return {
        "wq": pad_w(params["wq"]), "bq": pad_b(params["bq"]),
        "wkv": jnp.concatenate([wk, wv], axis=1),
        "bkv": jnp.concatenate([bk, bv], axis=1),
        "wo": pad_w(params["wo"]), "bo": pad_b(params["bo"]),
        "H": H, "Hp": Hp, "mm_dtype": mm_dtype,
    }


def function_adapter(q, x, prepared, *, residual: bool = False,
                     batch_block=None, out_dtype=None):
    """q: (B, Nq, H), x: (B, Nx, H), prepared = prepare_params(raw_params).
    Returns (B, Nq, H)."""
    B, Nq, H = q.shape
    Bx, Nx, Hx = x.shape
    assert Bx == B and Hx == H and H == prepared["H"]

    Hp = prepared["Hp"]
    mm_dtype = prepared["mm_dtype"]
    pad = Hp - H
    out_dtype = out_dtype if out_dtype is not None else q.dtype

    def pad_act(a):
        a = a.astype(mm_dtype)
        return jnp.pad(a, ((0, 0), (0, 0), (0, pad))) if pad else a

    qp = pad_act(q)
    xp = pad_act(x)

    mm_itm = jnp.dtype(mm_dtype).itemsize
    out_itm = jnp.dtype(out_dtype).itemsize
    # wq + wkv + wo (single-buffered) + f32 biases
    weight_bytes = (4 * Hp * Hp) * mm_itm + 4 * Hp * 4

    budget = _vmem_budget_bytes()
    Bt = batch_block if batch_block is not None else _pick_batch_block(
        B, Nq, Nx, Hp, mm_itm, out_itm, weight_bytes, budget)
    assert B % Bt == 0, "batch_block must divide B"
    steps = B // Bt

    kernel = functools.partial(
        _adapter_kernel, residual=residual,
        scale=1.0 / (float(H) ** 0.5),
        approx_recip=(jnp.dtype(mm_dtype) == jnp.dtype(jnp.bfloat16)))

    # NOTE(v7x): with steps >= 2 and large per-step work, switch this axis to
    # pltpu.CORE_PARALLEL to shard across both TensorCores.  For the single
    # step / tiny-work case, splitting would only add fixed overhead.
    semantics = ("arbitrary",) if steps == 1 else ("parallel",)

    def _build(single_buffer_weights):
        wkw = {}
        if single_buffer_weights:
            # Constant index_map -> fetched once; no need to double-buffer.
            wkw["pipeline_mode"] = pl.Buffered(1)
        wq_spec = pl.BlockSpec((Hp, Hp), lambda b: (0, 0), **wkw)
        wkv_spec = pl.BlockSpec((Hp, 2 * Hp), lambda b: (0, 0), **wkw)
        b_spec = pl.BlockSpec((1, Hp), lambda b: (0, 0), **wkw)
        bkv_spec = pl.BlockSpec((1, 2 * Hp), lambda b: (0, 0), **wkw)
        return pl.pallas_call(
            kernel,
            out_shape=jax.ShapeDtypeStruct((B, Nq, Hp), out_dtype),
            grid_spec=pltpu.PrefetchScalarGridSpec(
                num_scalar_prefetch=0,
                grid=(steps,),
                in_specs=[
                    pl.BlockSpec((Bt, Nq, Hp), lambda b: (b, 0, 0)),   # q
                    pl.BlockSpec((Bt, Nx, Hp), lambda b: (b, 0, 0)),   # x
                    wq_spec, b_spec,                                   # W_Q, b_Q
                    wkv_spec, bkv_spec,                                # W_KV, b_KV
                    wq_spec, b_spec,                                   # W_O, b_O
                ],
                out_specs=pl.BlockSpec((Bt, Nq, Hp), lambda b: (b, 0, 0)),
            ),
            compiler_params=pltpu.CompilerParams(
                dimension_semantics=semantics,
                vmem_limit_bytes=int(budget)),
        )

    args = (qp, xp, prepared["wq"], prepared["bq"],
            prepared["wkv"], prepared["bkv"],
            prepared["wo"], prepared["bo"])
    try:
        out = _build(True)(*args)
    except Exception:
        # Fallback for JAX versions without BlockSpec pipeline_mode/Buffered(1).
        out = _build(False)(*args)

    return out[..., :H] if pad else out


# ---------------------------------------------------------------------------
# Synthetic params + pure-JAX reference
# ---------------------------------------------------------------------------
def init_params(key, hidden_size, num_query_token):
    """Deterministic synthetic parameter init (matches module shapes)."""
    ks = jax.random.split(key, 9)

    def lin(kw):
        # (H_in, H_out) layout so y = x @ W + b.
        return jax.random.normal(kw, (hidden_size, hidden_size), jnp.float32) * 0.02

    return {
        # query_tokens exists in the module but is unused in forward().
        "query_tokens": jax.random.normal(
            ks[0], (1, num_query_token, hidden_size), jnp.float32) * 0.02,
        "wq": lin(ks[1]), "bq": jnp.zeros((1, hidden_size), jnp.float32),
        "wk": lin(ks[2]), "bk": jnp.zeros((1, hidden_size), jnp.float32),
        "wv": lin(ks[3]), "bv": jnp.zeros((1, hidden_size), jnp.float32),
        "wo": lin(ks[4]), "bo": jnp.zeros((1, hidden_size), jnp.float32),
    }


def function_adapter_ref(q, x, params, *, residual: bool = False):
    """Pure-JAX reference for correctness checking."""
    Q = q @ params["wq"] + params["bq"][0]
    K = x @ params["wk"] + params["bk"][0]
    V = x @ params["wv"] + params["bv"][0]
    A = jnp.einsum("bqh,bkh->bqk", Q, K) / (Q.shape[-1] ** 0.5)
    A = jax.nn.softmax(A, axis=-1)
    out = Q + jnp.einsum("bqk,bkh->bqh", A, V)
    proj = jax.nn.relu(out @ params["wo"] + params["bo"][0])
    return out + proj if residual else proj


if __name__ == "__main__":
    B, Nq, Nx, H = 2, 8, 16, 32   # small shapes consistent with the module
    key = jax.random.PRNGKey(0)
    kp, kq, kx = jax.random.split(key, 3)

    params = init_params(kp, hidden_size=H, num_query_token=Nq)
    q = jax.random.normal(kq, (B, Nq, H), jnp.float32)
    x = jax.random.normal(kx, (B, Nx, H), jnp.float32)

    # Exact path (f32 matmul inputs, exact reciprocal): tight comparison.
    prep_f32 = prepare_params(params, use_bf16=False)
    for residual in (False, True):
        out = jax.block_until_ready(
            function_adapter(q, x, prep_f32, residual=residual))
        ref = function_adapter_ref(q, x, params, residual=residual)
        assert out.shape == (B, Nq, H)
        assert jnp.allclose(out, ref, atol=2e-3, rtol=2e-3)

    # Fast path (bf16 matmul inputs, f32 accumulation): looser tolerance.
    prep_bf16 = prepare_params(params, use_bf16=True)
    out_bf16 = jax.block_until_ready(
        function_adapter(q, x, prep_bf16, residual=False))
    ref = function_adapter_ref(q, x, params, residual=False)
    assert out_bf16.shape == (B, Nq, H)
    assert jnp.allclose(out_bf16, ref, atol=5e-2, rtol=5e-2)

    print("KERNEL_OK")
</pallas_src>

<mosaic_0001>
module attributes {stable_mosaic.version = 11 : i64} {
  func.func @_adapter_kernel(%arg0: i32, %arg1: memref<2x8x128xf32, #tpu.memory_space<vmem>>, %arg2: memref<2x16x128xf32, #tpu.memory_space<vmem>>, %arg3: memref<128x128xf32, #tpu.memory_space<vmem>>, %arg4: memref<1x128xf32, #tpu.memory_space<vmem>>, %arg5: memref<128x256xf32, #tpu.memory_space<vmem>>, %arg6: memref<1x256xf32, #tpu.memory_space<vmem>>, %arg7: memref<128x128xf32, #tpu.memory_space<vmem>>, %arg8: memref<1x128xf32, #tpu.memory_space<vmem>>, %arg9: memref<2x8x128xf32, #tpu.memory_space<vmem>>) attributes {dimension_semantics = [#tpu.dimension_semantics<arbitrary>], iteration_bounds = array<i64: 1>, scalar_prefetch = 0 : i64, scratch_operands = 0 : i64, tpu.core_type = #tpu.core_type<tc>, window_params = [{transform_indices = @transform_0, window_bounds = array<i64: 2, 8, 128>}, {transform_indices = @transform_1, window_bounds = array<i64: 2, 16, 128>}, {pipeline_mode = #tpu.pipeline_mode<synchronous>, transform_indices = @transform_2, window_bounds = array<i64: 128, 128>}, {pipeline_mode = #tpu.pipeline_mode<synchronous>, transform_indices = @transform_3, window_bounds = array<i64: 1, 128>}, {pipeline_mode = #tpu.pipeline_mode<synchronous>, transform_indices = @transform_4, window_bounds = array<i64: 128, 256>}, {pipeline_mode = #tpu.pipeline_mode<synchronous>, transform_indices = @transform_5, window_bounds = array<i64: 1, 256>}, {pipeline_mode = #tpu.pipeline_mode<synchronous>, transform_indices = @transform_6, window_bounds = array<i64: 128, 128>}, {pipeline_mode = #tpu.pipeline_mode<synchronous>, transform_indices = @transform_7, window_bounds = array<i64: 1, 128>}, {transform_indices = @transform_8, window_bounds = array<i64: 2, 8, 128>}]} {
    %c0 = arith.constant 0 : index
    %c0_0 = arith.constant 0 : index
    %c0_1 = arith.constant 0 : index
    %0 = vector.load %arg1[%c0, %c0_0, %c0_1] : memref<2x8x128xf32, #tpu.memory_space<vmem>>, vector<2x8x128xf32>
    %1 = vector.shape_cast %0 : vector<2x8x128xf32> to vector<16x128xf32>
    %c0_2 = arith.constant 0 : index
    %c0_3 = arith.constant 0 : index
    %c0_4 = arith.constant 0 : index
    %2 = vector.load %arg2[%c0_2, %c0_3, %c0_4] : memref<2x16x128xf32, #tpu.memory_space<vmem>>, vector<2x16x128xf32>
    %3 = vector.shape_cast %2 : vector<2x16x128xf32> to vector<32x128xf32>
    %c0_5 = arith.constant 0 : index
    %c0_6 = arith.constant 0 : index
    %4 = vector.load %arg3[%c0_5, %c0_6] : memref<128x128xf32, #tpu.memory_space<vmem>>, vector<128x128xf32>
    %cst = arith.constant dense<0.000000e+00> : vector<16x128xf32>
    %5 = tpu.matmul %1, %4, %cst {dimension_numbers = #tpu.dot_dimension_numbers<[1], [0], [0], [1], [0, 0, 1, 1], [], []>} : vector<16x128xf32>, vector<128x128xf32>, vector<16x128xf32> -> vector<16x128xf32>
    %c0_7 = arith.constant 0 : index
    %c0_8 = arith.constant 0 : index
    %6 = vector.load %arg4[%c0_7, %c0_8] : memref<1x128xf32, #tpu.memory_space<vmem>>, vector<1x128xf32>
    %7 = vector.broadcast %6 : vector<1x128xf32> to vector<16x128xf32>
    %8 = arith.addf %5, %7 : vector<16x128xf32>
    %c0_9 = arith.constant 0 : index
    %c0_10 = arith.constant 0 : index
    %9 = vector.load %arg5[%c0_9, %c0_10] : memref<128x256xf32, #tpu.memory_space<vmem>>, vector<128x256xf32>
    %cst_11 = arith.constant dense<0.000000e+00> : vector<32x256xf32>
    %10 = tpu.matmul %3, %9, %cst_11 {dimension_numbers = #tpu.dot_dimension_numbers<[1], [0], [0], [1], [0, 0, 1, 1], [], []>} : vector<32x128xf32>, vector<128x256xf32>, vector<32x256xf32> -> vector<32x256xf32>
    %c0_12 = arith.constant 0 : index
    %c0_13 = arith.constant 0 : index
    %11 = vector.load %arg6[%c0_12, %c0_13] : memref<1x256xf32, #tpu.memory_space<vmem>>, vector<1x256xf32>
    %12 = vector.broadcast %11 : vector<1x256xf32> to vector<32x256xf32>
    %13 = arith.addf %10, %12 : vector<32x256xf32>
    %14 = vector.shape_cast %8 : vector<16x128xf32> to vector<2x8x128xf32>
    %15 = vector.extract_strided_slice %13 {offsets = [0, 0], sizes = [32, 128], strides = [1, 1]} : vector<32x256xf32> to vector<32x128xf32>
    %16 = vector.shape_cast %15 : vector<32x128xf32> to vector<2x16x128xf32>
    %17 = vector.extract_strided_slice %13 {offsets = [0, 128], sizes = [32, 128], strides = [1, 1]} : vector<32x256xf32> to vector<32x128xf32>
    %18 = vector.shape_cast %17 : vector<32x128xf32> to vector<2x16x128xf32>
    %cst_14 = arith.constant 0.176776692 : f32
    %19 = vector.broadcast %cst_14 : f32 to vector<2x8x128xf32>
    %20 = arith.mulf %14, %19 : vector<2x8x128xf32>
    "tpu.trace_start"() <{level = 10 : i32, message = "bqd,bkd->bqk"}> : () -> ()
    %cst_15 = arith.constant dense<0.000000e+00> : vector<2x8x16xf32>
    %21 = tpu.matmul %20, %16, %cst_15 {dimension_numbers = #tpu.dot_dimension_numbers<[2], [2], [1], [1], [0, 0, 0, 1, 1, 1], [0], [0]>} : vector<2x8x128xf32>, vector<2x16x128xf32>, vector<2x8x16xf32> -> vector<2x8x16xf32>
    "tpu.trace_stop"() : () -> ()
    %cst_16 = arith.constant dense<0xFF800000> : vector<2x8xf32>
    %22 = vector.multi_reduction <maximumf>, %21, %cst_16 [2] : vector<2x8x16xf32> to vector<2x8xf32>
    %23 = vector.shape_cast %22 : vector<2x8xf32> to vector<2x8x1xf32>
    %24 = vector.broadcast %23 : vector<2x8x1xf32> to vector<2x8x16xf32>
    %25 = arith.subf %21, %24 : vector<2x8x16xf32>
    %26 = math.exp %25 : vector<2x8x16xf32>
    %cst_17 = arith.constant dense<0.000000e+00> : vector<2x8xf32>
    %27 = vector.multi_reduction <add>, %26, %cst_17 [2] : vector<2x8x16xf32> to vector<2x8xf32>
    %28 = vector.shape_cast %27 : vector<2x8xf32> to vector<2x8x1xf32>
    %29 = vector.broadcast %28 : vector<2x8x1xf32> to vector<2x8x16xf32>
    %30 = arith.divf %26, %29 : vector<2x8x16xf32>
    "tpu.trace_start"() <{level = 10 : i32, message = "bqk,bkd->bqd"}> : () -> ()
    %cst_18 = arith.constant dense<0.000000e+00> : vector<2x8x128xf32>
    %31 = tpu.matmul %30, %18, %cst_18 {dimension_numbers = #tpu.dot_dimension_numbers<[2], [1], [1], [2], [0, 0, 0, 1, 1, 2], [0], [0]>} : vector<2x8x16xf32>, vector<2x16x128xf32>, vector<2x8x128xf32> -> vector<2x8x128xf32>
    "tpu.trace_stop"() : () -> ()
    %32 = arith.addf %14, %31 : vector<2x8x128xf32>
    %33 = vector.shape_cast %32 : vector<2x8x128xf32> to vector<16x128xf32>
    %c0_19 = arith.constant 0 : index
    %c0_20 = arith.constant 0 : index
    %34 = vector.load %arg7[%c0_19, %c0_20] : memref<128x128xf32, #tpu.memory_space<vmem>>, vector<128x128xf32>
    %cst_21 = arith.constant dense<0.000000e+00> : vector<16x128xf32>
    %35 = tpu.matmul %33, %34, %cst_21 {dimension_numbers = #tpu.dot_dimension_numbers<[1], [0], [0], [1], [0, 0, 1, 1], [], []>} : vector<16x128xf32>, vector<128x128xf32>, vector<16x128xf32> -> vector<16x128xf32>
    %c0_22 = arith.constant 0 : index
    %c0_23 = arith.constant 0 : index
    %36 = vector.load %arg8[%c0_22, %c0_23] : memref<1x128xf32, #tpu.memory_space<vmem>>, vector<1x128xf32>
    %37 = vector.broadcast %36 : vector<1x128xf32> to vector<16x128xf32>
    %38 = arith.addf %35, %37 : vector<16x128xf32>
    %cst_24 = arith.constant 0.000000e+00 : f32
    %39 = vector.broadcast %cst_24 : f32 to vector<16x128xf32>
    %40 = arith.maximumf %38, %39 : vector<16x128xf32>
    %41 = vector.shape_cast %40 : vector<16x128xf32> to vector<2x8x128xf32>
    %c0_25 = arith.constant 0 : index
    %c0_26 = arith.constant 0 : index
    %c0_27 = arith.constant 0 : index
    %42 = vector.load %arg9[%c0_25, %c0_26, %c0_27] : memref<2x8x128xf32, #tpu.memory_space<vmem>>, vector<2x8x128xf32>
    tpu.vector_store %arg9[%c0_25, %c0_26, %c0_27], %41 {strides = array<i32>} : memref<2x8x128xf32, #tpu.memory_space<vmem>>, vector<2x8x128xf32>,
    return
  }
  func.func @transform_0(%arg0: i32) -> (i32, i32, i32) {
    %c0_i32 = arith.constant 0 : i32
    %c0_i32_0 = arith.constant 0 : i32
    %c0_i32_1 = arith.constant 0 : i32
    return %arg0, %c0_i32, %c0_i32_0 : i32, i32, i32
  }
  func.func @transform_1(%arg0: i32) -> (i32, i32, i32) {
    %c0_i32 = arith.constant 0 : i32
    %c0_i32_0 = arith.constant 0 : i32
    %c0_i32_1 = arith.constant 0 : i32
    return %arg0, %c0_i32, %c0_i32_0 : i32, i32, i32
  }
  func.func @transform_2(%arg0: i32) -> (i32, i32) {
    %c0_i32 = arith.constant 0 : i32
    %c0_i32_0 = arith.constant 0 : i32
    %c0_i32_1 = arith.constant 0 : i32
    return %c0_i32, %c0_i32_0 : i32, i32
  }
  func.func @transform_3(%arg0: i32) -> (i32, i32) {
    %c0_i32 = arith.constant 0 : i32
    %c0_i32_0 = arith.constant 0 : i32
    %c0_i32_1 = arith.constant 0 : i32
    return %c0_i32, %c0_i32_0 : i32, i32
  }
  func.func @transform_4(%arg0: i32) -> (i32, i32) {
    %c0_i32 = arith.constant 0 : i32
    %c0_i32_0 = arith.constant 0 : i32
    %c0_i32_1 = arith.constant 0 : i32
    return %c0_i32, %c0_i32_0 : i32, i32
  }
  func.func @transform_5(%arg0: i32) -> (i32, i32) {
    %c0_i32 = arith.constant 0 : i32
    %c0_i32_0 = arith.constant 0 : i32
    %c0_i32_1 = arith.constant 0 : i32
    return %c0_i32, %c0_i32_0 : i32, i32
  }
  func.func @transform_6(%arg0: i32) -> (i32, i32) {
    %c0_i32 = arith.constant 0 : i32
    %c0_i32_0 = arith.constant 0 : i32
    %c0_i32_1 = arith.constant 0 : i32
    return %c0_i32, %c0_i32_0 : i32, i32
  }
  func.func @transform_7(%arg0: i32) -> (i32, i32) {
    %c0_i32 = arith.constant 0 : i32
    %c0_i32_0 = arith.constant 0 : i32
    %c0_i32_1 = arith.constant 0 : i32
    return %c0_i32, %c0_i32_0 : i32, i32
  }
  func.func @transform_8(%arg0: i32) -> (i32, i32, i32) {
    %c0_i32 = arith.constant 0 : i32
    %c0_i32_0 = arith.constant 0 : i32
    %c0_i32_1 = arith.constant 0 : i32
    return %arg0, %c0_i32, %c0_i32_0 : i32, i32, i32
  }
}

module attributes {stable_mosaic.version = 11 : i64} {
  func.func @_adapter_kernel(%arg0: i32, %arg1: memref<2x8x128xf32, #tpu.memory_space<vmem>>, %arg2: memref<2x16x128xf32, #tpu.memory_space<vmem>>, %arg3: memref<128x128xf32, #tpu.memory_space<vmem>>, %arg4: memref<1x128xf32, #tpu.memory_space<vmem>>, %arg5: memref<128x256xf32, #tpu.memory_space<vmem>>, %arg6: memref<1x256xf32, #tpu.memory_space<vmem>>, %arg7: memref<128x128xf32, #tpu.memory_space<vmem>>, %arg8: memref<1x128xf32, #tpu.memory_space<vmem>>, %arg9: memref<2x8x128xf32, #tpu.memory_space<vmem>>) attributes {dimension_semantics = [#tpu.dimension_semantics<arbitrary>], iteration_bounds = array<i64: 1>, scalar_prefetch = 0 : i64, scratch_operands = 0 : i64, tpu.core_type = #tpu.core_type<tc>, window_params = [{transform_indices = @transform_0, window_bounds = array<i64: 2, 8, 128>}, {transform_indices = @transform_1, window_bounds = array<i64: 2, 16, 128>}, {pipeline_mode = #tpu.pipeline_mode<synchronous>, transform_indices = @transform_2, window_bounds = array<i64: 128, 128>}, {pipeline_mode = #tpu.pipeline_mode<synchronous>, transform_indices = @transform_3, window_bounds = array<i64: 1, 128>}, {pipeline_mode = #tpu.pipeline_mode<synchronous>, transform_indices = @transform_4, window_bounds = array<i64: 128, 256>}, {pipeline_mode = #tpu.pipeline_mode<synchronous>, transform_indices = @transform_5, window_bounds = array<i64: 1, 256>}, {pipeline_mode = #tpu.pipeline_mode<synchronous>, transform_indices = @transform_6, window_bounds = array<i64: 128, 128>}, {pipeline_mode = #tpu.pipeline_mode<synchronous>, transform_indices = @transform_7, window_bounds = array<i64: 1, 128>}, {transform_indices = @transform_8, window_bounds = array<i64: 2, 8, 128>}]} {
    %c0 = arith.constant 0 : index
    %c0_0 = arith.constant 0 : index
    %c0_1 = arith.constant 0 : index
    %0 = vector.load %arg1[%c0, %c0_0, %c0_1] : memref<2x8x128xf32, #tpu.memory_space<vmem>>, vector<2x8x128xf32>
    %1 = vector.shape_cast %0 : vector<2x8x128xf32> to vector<16x128xf32>
    %c0_2 = arith.constant 0 : index
    %c0_3 = arith.constant 0 : index
    %c0_4 = arith.constant 0 : index
    %2 = vector.load %arg2[%c0_2, %c0_3, %c0_4] : memref<2x16x128xf32, #tpu.memory_space<vmem>>, vector<2x16x128xf32>
    %3 = vector.shape_cast %2 : vector<2x16x128xf32> to vector<32x128xf32>
    %c0_5 = arith.constant 0 : index
    %c0_6 = arith.constant 0 : index
    %4 = vector.load %arg3[%c0_5, %c0_6] : memref<128x128xf32, #tpu.memory_space<vmem>>, vector<128x128xf32>
    %cst = arith.constant dense<0.000000e+00> : vector<16x128xf32>
    %5 = tpu.matmul %1, %4, %cst {dimension_numbers = #tpu.dot_dimension_numbers<[1], [0], [0], [1], [0, 0, 1, 1], [], []>} : vector<16x128xf32>, vector<128x128xf32>, vector<16x128xf32> -> vector<16x128xf32>
    %c0_7 = arith.constant 0 : index
    %c0_8 = arith.constant 0 : index
    %6 = vector.load %arg4[%c0_7, %c0_8] : memref<1x128xf32, #tpu.memory_space<vmem>>, vector<1x128xf32>
    %7 = vector.broadcast %6 : vector<1x128xf32> to vector<16x128xf32>
    %8 = arith.addf %5, %7 : vector<16x128xf32>
    %c0_9 = arith.constant 0 : index
    %c0_10 = arith.constant 0 : index
    %9 = vector.load %arg5[%c0_9, %c0_10] : memref<128x256xf32, #tpu.memory_space<vmem>>, vector<128x256xf32>
    %cst_11 = arith.constant dense<0.000000e+00> : vector<32x256xf32>
    %10 = tpu.matmul %3, %9, %cst_11 {dimension_numbers = #tpu.dot_dimension_numbers<[1], [0], [0], [1], [0, 0, 1, 1], [], []>} : vector<32x128xf32>, vector<128x256xf32>, vector<32x256xf32> -> vector<32x256xf32>
    %c0_12 = arith.constant 0 : index
    %c0_13 = arith.constant 0 : index
    %11 = vector.load %arg6[%c0_12, %c0_13] : memref<1x256xf32, #tpu.memory_space<vmem>>, vector<1x256xf32>
    %12 = vector.broadcast %11 : vector<1x256xf32> to vector<32x256xf32>
    %13 = arith.addf %10, %12 : vector<32x256xf32>
    %14 = vector.shape_cast %8 : vector<16x128xf32> to vector<2x8x128xf32>
    %15 = vector.extract_strided_slice %13 {offsets = [0, 0], sizes = [32, 128], strides = [1, 1]} : vector<32x256xf32> to vector<32x128xf32>
    %16 = vector.shape_cast %15 : vector<32x128xf32> to vector<2x16x128xf32>
    %17 = vector.extract_strided_slice %13 {offsets = [0, 128], sizes = [32, 128], strides = [1, 1]} : vector<32x256xf32> to vector<32x128xf32>
    %18 = vector.shape_cast %17 : vector<32x128xf32> to vector<2x16x128xf32>
    %cst_14 = arith.constant 0.176776692 : f32
    %19 = vector.broadcast %cst_14 : f32 to vector<2x8x128xf32>
    %20 = arith.mulf %14, %19 : vector<2x8x128xf32>
    "tpu.trace_start"() <{level = 10 : i32, message = "bqd,bkd->bqk"}> : () -> ()
    %cst_15 = arith.constant dense<0.000000e+00> : vector<2x8x16xf32>
    %21 = tpu.matmul %20, %16, %cst_15 {dimension_numbers = #tpu.dot_dimension_numbers<[2], [2], [1], [1], [0, 0, 0, 1, 1, 1], [0], [0]>} : vector<2x8x128xf32>, vector<2x16x128xf32>, vector<2x8x16xf32> -> vector<2x8x16xf32>
    "tpu.trace_stop"() : () -> ()
    %cst_16 = arith.constant dense<0xFF800000> : vector<2x8xf32>
    %22 = vector.multi_reduction <maximumf>, %21, %cst_16 [2] : vector<2x8x16xf32> to vector<2x8xf32>
    %23 = vector.shape_cast %22 : vector<2x8xf32> to vector<2x8x1xf32>
    %24 = vector.broadcast %23 : vector<2x8x1xf32> to vector<2x8x16xf32>
    %25 = arith.subf %21, %24 : vector<2x8x16xf32>
    %26 = math.exp %25 : vector<2x8x16xf32>
    %cst_17 = arith.constant dense<0.000000e+00> : vector<2x8xf32>
    %27 = vector.multi_reduction <add>, %26, %cst_17 [2] : vector<2x8x16xf32> to vector<2x8xf32>
    %28 = vector.shape_cast %27 : vector<2x8xf32> to vector<2x8x1xf32>
    %29 = vector.broadcast %28 : vector<2x8x1xf32> to vector<2x8x16xf32>
    %30 = arith.divf %26, %29 : vector<2x8x16xf32>
    "tpu.trace_start"() <{level = 10 : i32, message = "bqk,bkd->bqd"}> : () -> ()
    %cst_18 = arith.constant dense<0.000000e+00> : vector<2x8x128xf32>
    %31 = tpu.matmul %30, %18, %cst_18 {dimension_numbers = #tpu.dot_dimension_numbers<[2], [1], [1], [2], [0, 0, 0, 1, 1, 2], [0], [0]>} : vector<2x8x16xf32>, vector<2x16x128xf32>, vector<2x8x128xf32> -> vector<2x8x128xf32>
    "tpu.trace_stop"() : () -> ()
    %32 = arith.addf %14, %31 : vector<2x8x128xf32>
    %33 = vector.shape_cast %32 : vector<2x8x128xf32> to vector<16x128xf32>
    %c0_19 = arith.constant 0 : index
    %c0_20 = arith.constant 0 : index
    %34 = vector.load %arg7[%c0_19, %c0_20] : memref<128x128xf32, #tpu.memory_space<vmem>>, vector<128x128xf32>
    %cst_21 = arith.constant dense<0.000000e+00> : vector<16x128xf32>
    %35 = tpu.matmul %33, %34, %cst_21 {dimension_numbers = #tpu.dot_dimension_numbers<[1], [0], [0], [1], [0, 0, 1, 1], [], []>} : vector<16x128xf32>, vector<128x128xf32>, vector<16x128xf32> -> vector<16x128xf32>
    %c0_22 = arith.constant 0 : index
    %c0_23 = arith.constant 0 : index
    %36 = vector.load %arg8[%c0_22, %c0_23] : memref<1x128xf32, #tpu.memory_space<vmem>>, vector<1x128xf32>
    %37 = vector.broadcast %36 : vector<1x128xf32> to vector<16x128xf32>
    %38 = arith.addf %35, %37 : vector<16x128xf32>
    %cst_24 = arith.constant 0.000000e+00 : f32
    %39 = vector.broadcast %cst_24 : f32 to vector<16x128xf32>
    %40 = arith.maximumf %38, %39 : vector<16x128xf32>
    %41 = vector.shape_cast %40 : vector<16x128xf32> to vector<2x8x128xf32>
    %c0_25 = arith.constant 0 : index
    %c0_26 = arith.constant 0 : index
    %c0_27 = arith.constant 0 : index
    %42 = vector.load %arg9[%c0_25, %c0_26, %c0_27] : memref<2x8x128xf32, #tpu.memory_space<vmem>>, vector<2x8x128xf32>
    tpu.vector_store %arg9[%c0_25, %c0_26, %c0_27], %41 {strides = array<i32>} : memref<2x8x128xf32, #tpu.memory_space<vmem>>, vector<2x8x128xf32>,
    return
  }
  func.func @transform_0(%arg0: i32) -> (i32, i32, i32) {
    %c0_i32 = arith.constant 0 : i32
    %c0_i32_0 = arith.constant 0 : i32
    %c0_i32_1 = arith.constant 0 : i32
    return %arg0, %c0_i32, %c0_i32_0 : i32, i32, i32
  }
  func.func @transform_1(%arg0: i32) -> (i32, i32, i32) {
    %c0_i32 = arith.constant 0 : i32
    %c0_i32_0 = arith.constant 0 : i32
    %c0_i32_1 = arith.constant 0 : i32
    return %arg0, %c0_i32, %c0_i32_0 : i32, i32, i32
  }
  func.func @transform_2(%arg0: i32) -> (i32, i32) {
    %c0_i32 = arith.constant 0 : i32
    %c0_i32_0 = arith.constant 0 : i32
    %c0_i32_1 = arith.constant 0 : i32
    return %c0_i32, %c0_i32_0 : i32, i32
  }
  func.func @transform_3(%arg0: i32) -> (i32, i32) {
    %c0_i32 = arith.constant 0 : i32
    %c0_i32_0 = arith.constant 0 : i32
    %c0_i32_1 = arith.constant 0 : i32
    return %c0_i32, %c0_i32_0 : i32, i32
  }
  func.func @transform_4(%arg0: i32) -> (i32, i32) {
    %c0_i32 = arith.constant 0 : i32
    %c0_i32_0 = arith.constant 0 : i32
    %c0_i32_1 = arith.constant 0 : i32
    return %c0_i32, %c0_i32_0 : i32, i32
  }
  func.func @transform_5(%arg0: i32) -> (i32, i32) {
    %c0_i32 = arith.constant 0 : i32
    %c0_i32_0 = arith.constant 0 : i32
    %c0_i32_1 = arith.constant 0 : i32
    return %c0_i32, %c0_i32_0 : i32, i32
  }
  func.func @transform_6(%arg0: i32) -> (i32, i32) {
    %c0_i32 = arith.constant 0 : i32
    %c0_i32_0 = arith.constant 0 : i32
    %c0_i32_1 = arith.constant 0 : i32
    return %c0_i32, %c0_i32_0 : i32, i32
  }
  func.func @transform_7(%arg0: i32) -> (i32, i32) {
    %c0_i32 = arith.constant 0 : i32
    %c0_i32_0 = arith.constant 0 : i32
    %c0_i32_1 = arith.constant 0 : i32
    return %c0_i32, %c0_i32_0 : i32, i32
  }
  func.func @transform_8(%arg0: i32) -> (i32, i32, i32) {
    %c0_i32 = arith.constant 0 : i32
    %c0_i32_0 = arith.constant 0 : i32
    %c0_i32_1 = arith.constant 0 : i32
    return %arg0, %c0_i32, %c0_i32_0 : i32, i32, i32
  }
}

</mosaic_0001>

<bundles_post_ra>
// kernel: tpu_custom_call.1
= control target key start
LH: loop header
LB: loop body
LE: loop exit
PB: predicated region body
PF: predicated region fallthrough
CT: control target
= control target key end

     0   :  { %13 = vsyncpa [#allocation3], 0  ;;  %s1391_s0 = inlined_call_operand.hbm [shape: f32[2,8,128], index: 0, kind: input, shape index: {}]   ;;  %s1392_s1 = inlined_call_operand.hbm [shape: f32[2,16,128], index: 1, kind: input, shape index: {}]   ;;  %s1393_s2 = inlined_call_operand.hbm [shape: f32[128,128], index: 2, kind: input, shape index: {}]   ;;  %s1394_s3 = inlined_call_operand.vmem [shape: f32[1,128], index: 3, kind: input, shape index: {}]   ;;  %s1395_s4 = inlined_call_operand.hbm [shape: f32[128,256], index: 4, kind: input, shape index: {}]   ;;  %s1396_s5 = inlined_call_operand.vmem [shape: f32[1,256], index: 5, kind: input, shape index: {}]   ;;  %s1397_s6 = inlined_call_operand.hbm [shape: f32[128,128], index: 6, kind: input, shape index: {}]   ;;  %s1398_s7 = inlined_call_operand.vmem [shape: f32[1,128], index: 7, kind: input, shape index: {}]   ;;  %s1399_s8 = inlined_call_operand.hbm [shape: f32[2,8,128], index: 8, kind: output, shape index: {}]  }
   0x1   :  { %14 = vsyncpa [#allocation6], 0 }
   0x2   :  { %15 = vsyncpa [#allocation9], 0 }
   0x3   :  { %16 = vsyncpa [#allocation4], 0  ;;  %s1188_s27 = smov [#allocation5]   ;;  %s1189_s29 = smov [#allocation8]  }
   0x4   :  { %s34_s28 = sshll.u32 %s1188_s27, 4  ;;  %s60_s30 = sshll.u32 %s1189_s29, 4  ;;  %s35_s28 = int_to_ptr.vmem [resolvable:$true] %s34_s28  ;;  %s1246_s30 = int_to_ptr.vmem [resolvable:$true] %s60_s30 }
   0x5   :  { %s1048_s11 = scalar_lea.hbm %s1392_s1, 512 }
   0x6   :  { %p1049_p0 = scmp.ne.s32.totalorder %s1392_s1, %s1048_s11  ;;  %p1052_p1 = scmp.lt.u32.totalorder %s1048_s11, %s1392_s1 }
   0x8   :  { %p1054_p2 = pnand %p1052_p1, %p1049_p0 }
   0xa   :  { %1057 = shalt.err (!%p1054_p2)
}
   0xb   :  { %s1058_s16 = scalar_lea.vmem %s35_s28, 512  ;;  %p1063_p4 = scmp.lt.s32.totalorder %s35_s28, %s35_s28 }
   0xc   :  { %p1059_p3 = scmp.ne.s32.totalorder %s35_s28, %s1058_s16  ;;  %p1064_p5 = scmp.lt.s32.totalorder %s1058_s16, %s1058_s16 }
   0xe   :  { %p1065_p6 = por %p1064_p5, %p1063_p4 }
  0x10   :  { %p1066_p7 = pnand %p1065_p6, %p1059_p3 }
  0x12   :  { %1069 = shalt.err (!%p1066_p7)
}
  0x13   :  { %s1190_s17 = smov 128   ;;  %s1191_s18 = smov 8  }
  0x14   :  { %40 = dma.hbm_to_vmem [thread:$0]  %s1392_s1, 512, %s35_s28, [#allocation6], %s1190_s17, %s1190_s17, %s1191_s18  }
  0x15   :  { %s1070_s23 = scalar_lea.hbm %s1395_s4, 4096 }
  0x16   :  { %p1071_p8 = scmp.ne.s32.totalorder %s1395_s4, %s1070_s23  ;;  %p1074_p9 = scmp.lt.u32.totalorder %s1070_s23, %s1395_s4 }
  0x18   :  { %p1076_p10 = pnand %p1074_p9, %p1071_p8 }
  0x1a   :  { %1079 = shalt.err (!%p1076_p10)
}
  0x1b   :  { %s1080_s29 = scalar_lea.vmem %s1246_s30, 4096  ;;  %p1085_p12 = scmp.lt.s32.totalorder %s1246_s30, %s1246_s30 }
  0x1c   :  { %p1081_p11 = scmp.ne.s32.totalorder %s1246_s30, %s1080_s29  ;;  %p1086_p13 = scmp.lt.s32.totalorder %s1080_s29, %s1080_s29 }
  0x1e   :  { %p1087_p0 = por %p1086_p13, %p1085_p12 }
  0x20   :  { %p1088_p1 = pnand %p1087_p0, %p1081_p11 }
  0x22   :  { %1091 = shalt.err (!%p1088_p1)
}
  0x23   :  { %s1192_s1 = smov 256   ;;  %s1193_s28 = smov 16  }
  0x24   :  { %66 = dma.hbm_to_vmem [thread:$0]  %s1395_s4, 4096, %s1246_s30, [#allocation9], %s1192_s1, %s1192_s1, %s1193_s28  }
  0x25   :  { %s1194_s11 = smov [#allocation2]   ;;  %s1195_s13 = smov [#allocation7]  }
  0x26   :  { %s22_s12 = sshll.u32 %s1194_s11, 4  ;;  %s46_s14 = sshll.u32 %s1195_s13, 4  ;;  %s23_s12 = int_to_ptr.vmem [resolvable:$true] %s22_s12  ;;  %s1280_s14 = int_to_ptr.vmem [resolvable:$true] %s46_s14 }
  0x27   :  { %s1092_s19 = scalar_lea.hbm %s1391_s0, 256 }
  0x28   :  { %p1093_p2 = scmp.ne.s32.totalorder %s1391_s0, %s1092_s19  ;;  %p1096_p3 = scmp.lt.u32.totalorder %s1092_s19, %s1391_s0 }
  0x2a   :  { %p1098_p4 = pnand %p1096_p3, %p1093_p2 }
  0x2c   :  { %1101 = shalt.err (!%p1098_p4)
}
  0x2d   :  { %s1102_s4 = scalar_lea.vmem %s23_s12, 256  ;;  %p1107_p6 = scmp.lt.s32.totalorder %s23_s12, %s23_s12 }
  0x2e   :  { %p1103_p5 = scmp.ne.s32.totalorder %s23_s12, %s1102_s4  ;;  %p1108_p7 = scmp.lt.s32.totalorder %s1102_s4, %s1102_s4 }
  0x30   :  { %p1109_p8 = por %p1108_p7, %p1107_p6 }
  0x32   :  { %p1110_p9 = pnand %p1109_p8, %p1103_p5 }
  0x34   :  { %1113 = shalt.err (!%p1110_p9)
}
  0x35   :  { %28 = dma.hbm_to_vmem [thread:$0]  %s1391_s0, 256, %s23_s12, [#allocation3], %s1190_s17, %s1190_s17, %s1191_s18  }
  0x36   :  { %s1114_s27 = scalar_lea.hbm %s1393_s2, 2048 }
  0x37   :  { %p1115_p10 = scmp.ne.s32.totalorder %s1393_s2, %s1114_s27  ;;  %p1118_p11 = scmp.lt.u32.totalorder %s1114_s27, %s1393_s2 }
  0x39   :  { %p1120_p12 = pnand %p1118_p11, %p1115_p10 }
  0x3b   :  { %1123 = shalt.err (!%p1120_p12)
}
  0x3c   :  { %s1124_s10 = scalar_lea.vmem %s1280_s14, 2048  ;;  %p1129_p0 = scmp.lt.s32.totalorder %s1280_s14, %s1280_s14 }
  0x3d   :  { %p1125_p13 = scmp.ne.s32.totalorder %s1280_s14, %s1124_s10  ;;  %p1130_p1 = scmp.lt.s32.totalorder %s1124_s10, %s1124_s10 }
  0x3f   :  { %p1131_p2 = por %p1130_p1, %p1129_p0 }
  0x41   :  { %p1132_p3 = pnand %p1131_p2, %p1125_p13 }
  0x43   :  { %1135 = shalt.err (!%p1132_p3)
}
  0x44   :  { %52 = dma.hbm_to_vmem [thread:$0]  %s1393_s2, 2048, %s1280_s14, [#allocation6], %s1190_s17, %s1190_s17, %s1191_s18  }
  0x45   :  { %s1196_s12 = smov [#allocation10]   ;;  %s1136_s19 = scalar_lea.hbm %s1397_s6, 2048 }
  0x46   :  { %s74_s13 = sshll.u32 %s1196_s12, 4  ;;  %p1137_p4 = scmp.ne.s32.totalorder %s1397_s6, %s1136_s19  ;;  %s75_s13 = int_to_ptr.vmem [resolvable:$true] %s74_s13 }
  0x47   :  { %p1140_p5 = scmp.lt.u32.totalorder %s1136_s19, %s1397_s6 }
  0x49   :  { %p1142_p6 = pnand %p1140_p5, %p1137_p4 }
  0x4b   :  { %1145 = shalt.err (!%p1142_p6)
}
  0x4c   :  { %s1146_s4 = scalar_lea.vmem %s75_s13, 2048  ;;  %p1151_p8 = scmp.lt.s32.totalorder %s75_s13, %s75_s13 }
  0x4d   :  { %p1147_p7 = scmp.ne.s32.totalorder %s75_s13, %s1146_s4  ;;  %p1152_p9 = scmp.lt.s32.totalorder %s1146_s4, %s1146_s4 }
  0x4f   :  { %p1153_p10 = por %p1152_p9, %p1151_p8 }
  0x51   :  { %p1154_p11 = pnand %p1153_p10, %p1147_p7 }
  0x53   :  { %1157 = shalt.err (!%p1154_p11)
}
  0x54   :  { %80 = dma.hbm_to_vmem [thread:$0]  %s1397_s6, 2048, %s75_s13, [#allocation9], %s1190_s17, %s1190_s17, %s1191_s18  }
  0x55   :  { %1180 = dma.done.wait [#allocation3], 256  }
  0x56   :  { %1181 = vsyncadd [#allocation3], 4294967040 }
  0x57   :  { %1182 = dma.done.wait [#allocation6], 2560  }
  0x58   :  { %1183 = vsyncadd [#allocation6], 4294964736 }
  0x59   :  { %1184 = dma.done.wait [#allocation9], 6144  }
  0x5a   :  { %1185 = vsyncadd [#allocation9], 4294961152  ;;  %v1197_v0 = vmov 0.0   ;;  %v203_v1 = vld [vmem:[#allocation8 + $0x8] sm:$0xff]  ;;  %v205_v2 = vld [vmem:[#allocation8 + $0x18] sm:$0xff]  ;;  %vm1199_vm0 = vmmov 0  }
  0x5b   :  { %310 = vmatprep.mubr.f32.mxu1 %v1197_v0  ;;  %v202_v3 = vld [vmem:[#allocation8] sm:$0xff]  ;;  %v951_v4 = vpack.c.bf16 %v205_v2, %v203_v1  ;;  %v204_v5 = vld [vmem:[#allocation8 + $0x10] sm:$0xff]  ;;  %v207_v6 = vld [vmem:[#allocation8 + $0x28] sm:$0xff]  ;;  %vm477_vm1 = vcmask 130048   ;;  %s1200_s26 = smov [#allocation11]  }
  0x5c   :  { %v209_v7 = vld [vmem:[#allocation8 + $0x38] sm:$0xff]  ;;  %v953_v8 = vpack.c.bf16 %v204_v5, %v202_v3  ;;  %v206_v10 = vld [vmem:[#allocation8 + $0x20] sm:$0xff]  ;;  %v208_v11 = vld [vmem:[#allocation8 + $0x30] sm:$0xff]  ;;  %s755_s27 = sshll.u32 %s1200_s26, 4  ;;  %s756_s27 = int_to_ptr.vmem [resolvable:$true] %s755_s27 }
  0x5d   :  { %v955_v9 = vpack.c.bf16 %v209_v7, %v207_v6  ;;  %v211_v12 = vld [vmem:[#allocation8 + $0x48] sm:$0xff]  ;;  %952 = vmatprep.subr.bf16.mxu1 %v951_v4  ;;  %v213_v13 = vld [vmem:[#allocation8 + $0x58] sm:$0xff]  ;;  %v957_v14 = vpack.c.bf16 %v208_v11, %v206_v10  ;;  %v104_v15 = vld [vmem:[#allocation7] sm:$0xff]  ;;  %s1158_s29 = scalar_lea.vmem %s756_s27, 256  ;;  %p1163_p13 = scmp.lt.s32.totalorder %s756_s27, %s756_s27 }
  0x5e   :  { %954 = vmatpush1.bf16.msra.mxu1 %v953_v8  ;;  %v105_v16 = vld [vmem:[#allocation7 + $0x8] sm:$0xff]  ;;  %v959_v17 = vpack.c.bf16 %v213_v13, %v211_v12  ;;  %v210_v18 = vld [vmem:[#allocation8 + $0x40] sm:$0xff]  ;;  %v212_v19 = vld [vmem:[#allocation8 + $0x50] sm:$0xff]  ;;  %p1159_p12 = scmp.ne.s32.totalorder %s756_s27, %s1158_s29  ;;  %p1164_p0 = scmp.lt.s32.totalorder %s1158_s29, %s1158_s29 }
  0x5f   :  { %956 = vmatprep.subr.bf16.mxu1 %v955_v9  ;;  %v919_v20 = vpack.c.bf16 %v105_v16, %v104_v15  ;;  %v215_v21 = vld [vmem:[#allocation8 + $0x68] sm:$0xff]  ;;  %v217_v22 = vld [vmem:[#allocation8 + $0x78] sm:$0xff]  ;;  %v106_v23 = vld [vmem:[#allocation7 + $0x10] sm:$0xff]  ;;  %v961_v26 = vpack.c.bf16 %v212_v19, %v210_v18  ;;  %v1198_v16 = vmov 0.0|0.0  }
  0x60   :  { %v107_v24 = vld [vmem:[#allocation7 + $0x18] sm:$0xff]  ;;  %v108_v27 = vld [vmem:[#allocation7 + $0x20] sm:$0xff]  ;;  %v109_v28 = vld [vmem:[#allocation7 + $0x28] sm:$0xff]  ;;  %v963_v29 = vpack.c.bf16 %v217_v22, %v215_v21  ;;  %p1165_p1 = por %p1164_p0, %p1163_p13 }
  0x61   :  { %920 = vmatprep.subr.bf16.mxu0 %v919_v20  ;;  %v923_v25 = vpack.c.bf16 %v107_v24, %v106_v23  ;;  %v214_v30 = vld [vmem:[#allocation8 + $0x60] sm:$0xff]  ;;  %v216_v31 = vld [vmem:[#allocation8 + $0x70] sm:$0xff]  ;;  %v219_v32 = vld [vmem:[#allocation8 + $0x88] sm:$0xff]  ;;  %v927_v33 = vpack.c.bf16 %v109_v28, %v108_v27 }
  0x62   :  { %958 = vmatpush1.bf16.msra.mxu1 %v957_v14  ;;  %922 = vmatpush3.bf16.msra.mxu0 %v919_v20  ;;  %v221_v34 = vld [vmem:[#allocation8 + $0x98] sm:$0xff]  ;;  %v110_v35 = vld [vmem:[#allocation7 + $0x30] sm:$0xff]  ;;  %v965_v37 = vpack.c.bf16 %v216_v31, %v214_v30  ;;  %v218_v39 = vld [vmem:[#allocation8 + $0x80] sm:$0xff]  ;;  %p1166_p2 = pnand %p1165_p1, %p1159_p12 }
  0x63   :  { %960 = vmatprep.subr.bf16.mxu1 %v959_v17  ;;  %924 = vmatprep.subr.bf16.mxu0 %v923_v25  ;;  %v111_v36 = vld [vmem:[#allocation7 + $0x38] sm:$0xff]  ;;  %v967_v38 = vpack.c.bf16 %v221_v34, %v219_v32  ;;  %v220_v40 = vld [vmem:[#allocation8 + $0x90] sm:$0xff]  ;;  %v223_v41 = vld [vmem:[#allocation8 + $0xa8] sm:$0xff]  ;;  %v236_v17 = vlaneseq }
  0x64   :  { %v931_v42 = vpack.c.bf16 %v111_v36, %v110_v35  ;;  %v225_v43 = vld [vmem:[#allocation8 + $0xb8] sm:$0xff]  ;;  %v112_v44 = vld [vmem:[#allocation7 + $0x40] sm:$0xff]  ;;  %v113_v45 = vld [vmem:[#allocation7 + $0x48] sm:$0xff]  ;;  %v969_v46 = vpack.c.bf16 %v220_v40, %v218_v39 }
  0x65   :  { %v222_v47 = vld [vmem:[#allocation8 + $0xa0] sm:$0xff]  ;;  %v971_v48 = vpack.c.bf16 %v225_v43, %v223_v41  ;;  %v224_v49 = vld [vmem:[#allocation8 + $0xb0] sm:$0xff]  ;;  %v227_v50 = vld [vmem:[#allocation8 + $0xc8] sm:$0xff]  ;;  %v935_v51 = vpack.c.bf16 %v113_v45, %v112_v44  ;;  %v237_v18 = vshrl.u32 %v236_v17, 7 }
  0x66   :  { %962 = vmatpush1.bf16.msra.mxu1 %v961_v26  ;;  %926 = vmatpush3.bf16.msra.mxu0 %v923_v25  ;;  %v98_v52 = vld [vmem:[#allocation2] sm:$0xff]  ;;  %v229_v53 = vld [vmem:[#allocation8 + $0xd8] sm:$0xff]  ;;  %v973_v56 = vpack.c.bf16 %v224_v49, %v222_v47  ;;  %v226_v58 = vld [vmem:[#allocation8 + $0xc0] sm:$0xff] }
  0x67   :  { %964 = vmatprep.subr.bf16.mxu1 %v963_v29  ;;  %928 = vmatprep.subr.bf16.mxu0 %v927_v33  ;;  %v114_v54 = vld [vmem:[#allocation7 + $0x50] sm:$0xff]  ;;  %v115_v55 = vld [vmem:[#allocation7 + $0x58] sm:$0xff]  ;;  %v975_v57 = vpack.c.bf16 %v229_v53, %v227_v50  ;;  %v231_v60 = vld [vmem:[#allocation8 + $0xe8] sm:$0xff]  ;;  %v238_v19 = vsub.s32 0, %v237_v18  ;;  %v242_v21 = vsub.s32 1, %v237_v18 }
  0x68   :  { %853 = vmatprep.mubr.f32.mxu0 %v98_v52  ;;  %v228_v59 = vld [vmem:[#allocation8 + $0xd0] sm:$0xff]  ;;  %v939_v61 = vpack.c.bf16 %v115_v55, %v114_v54  ;;  %v233_v62 = vld [vmem:[#allocation8 + $0xf8] sm:$0xff]  ;;  %v116_v63 = vld [vmem:[#allocation7 + $0x60] sm:$0xff] }
  0x69   :  { %v117_v1 = vld [vmem:[#allocation7 + $0x68] sm:$0xff]  ;;  %v977_v2 = vpack.c.bf16 %v228_v59, %v226_v58  ;;  %v979_v3 = vpack.c.bf16 %v233_v62, %v231_v60  ;;  %v230_v4 = vld [vmem:[#allocation8 + $0xe0] sm:$0xff]  ;;  %v232_v5 = vld [vmem:[#allocation8 + $0xf0] sm:$0xff] }
  0x6a   :  { %966 = vmatpush1.bf16.msra.mxu1 %v965_v37  ;;  %930 = vmatpush3.bf16.msra.mxu0 %v927_v33  ;;  %v943_v6 = vpack.c.bf16 %v117_v1, %v116_v63  ;;  %v118_v7 = vld [vmem:[#allocation7 + $0x70] sm:$0xff]  ;;  %v119_v8 = vld [vmem:[#allocation7 + $0x78] sm:$0xff]  ;;  %v981_v9 = vpack.c.bf16 %v232_v5, %v230_v4  ;;  %v100_v11 = vld [vmem:[#allocation5] sm:$0xff] }
  0x6b   :  { %968 = vmatprep.subr.bf16.mxu1 %v967_v38  ;;  %932 = vmatprep.subr.bf16.mxu0 %v931_v42  ;;  %v947_v10 = vpack.c.bf16 %v119_v8, %v118_v7  ;;  %v101_v12 = vld [vmem:[#allocation5 + $0x8] sm:$0xff]  ;;  %v99_v13 = vld [vmem:[#allocation2 + $0x8] sm:$0xff]  ;;  %v102_v14 = vld [vmem:[#allocation5 + $0x10] sm:$0xff] }
  0x6c   :  { %v103_v15 = vld [vmem:[#allocation5 + $0x18] sm:$0xff]  ;;  %v234_v20 = vld [vmem:[%s1396_s5] sm:$0x3]  ;;  %v648_v4 = vld [vmem:[#allocation10] sm:$0xff] }
  0x6d   :  { %v239_v23 = vrot.slane %v234_v20, %v238_v19  ;;  %v243_v25 = vrot.slane %v234_v20, %v242_v21  ;;  %v769_v31 = vld [vmem:[%s1394_s3] ss:$0 sm:$0xff]  ;;  %v649_v5 = vld [vmem:[#allocation10 + $0x8] sm:$0xff]  ;;  %v651_v8 = vld [vmem:[#allocation10 + $0x18] sm:$0xff] }
  0x6e   :  { %970 = vmatpush1.bf16.msra.mxu1 %v969_v46  ;;  %934 = vmatpush3.bf16.msra.mxu0 %v931_v42  ;;  %v995_v7 = vpack.c.bf16 %v649_v5, %v648_v4  ;;  %v657_v17 = vld [vmem:[#allocation10 + $0x48] sm:$0xff]  ;;  %v658_v19 = vld [vmem:[#allocation10 + $0x50] sm:$0xff]  ;;  %v659_v20 = vld [vmem:[#allocation10 + $0x58] sm:$0xff] }
  0x6f   :  { %972 = vmatprep.subr.bf16.mxu1 %v971_v48  ;;  %936 = vmatprep.subr.bf16.mxu0 %v935_v51  ;;  %v1015_v21 = vpack.c.bf16 %v659_v20, %v658_v19 }
  0x72   :  { %974 = vmatpush1.bf16.msra.mxu1 %v973_v56  ;;  %938 = vmatpush3.bf16.msra.mxu0 %v935_v51 }
  0x73   :  { %976 = vmatprep.subr.bf16.mxu1 %v975_v57  ;;  %940 = vmatprep.subr.bf16.mxu0 %v939_v61 }
  0x76   :  { %978 = vmatpush1.bf16.msra.mxu1 %v977_v2  ;;  %942 = vmatpush3.bf16.msra.mxu0 %v939_v61 }
  0x77   :  { %980 = vmatprep.subr.bf16.mxu1 %v979_v3  ;;  %944 = vmatprep.subr.bf16.mxu0 %v943_v6 }
  0x7a   :  { %982 = vmatpush1.bf16.msra.mxu1 %v981_v9  ;;  %946 = vmatpush3.bf16.msra.mxu0 %v943_v6  ;;  %v650_v6 = vld [vmem:[#allocation10 + $0x10] sm:$0xff] }
  0x7b   :  { %948 = vmatprep.subr.bf16.mxu0 %v947_v10  ;;  %v999_v9 = vpack.c.bf16 %v651_v8, %v650_v6  ;;  %996 = vmatprep.subr.bf16.mxu1 %v995_v7 }
  0x7d   :  { %311 = vmatmul.mubr.f32.vlgmr.msra.gmra.mrb[0].mxu1 %v100_v11  ;;  %v653_v11 = vld [vmem:[#allocation10 + $0x28] sm:$0xff] }
  0x7e   :  { %316 = vmatprep.mubr.f32.mxu1 %v1197_v0  ;;  %950 = vmatpush3.bf16.msra.mxu0 %v947_v10  ;;  %v652_v10 = vld [vmem:[#allocation10 + $0x20] sm:$0xff] }
  0x7f   :  { %983 = vmatprep.subr.bf16.mxu0 %v1198_v16  ;;  %998 = vmatpush3.bf16.msra.mxu1 %v995_v7 }
  0x80   :  { %1000 = vmatprep.subr.bf16.mxu1 %v999_v9 }
  0x81   :  { %317 = vmatmul.mubr.f32.gmra.mrb[2].mxu1 %v101_v12  ;;  %854 = vmatmul.mubr.f32.vlgmr.msra.gmra.mrb[0].mxu0 %v99_v13  ;;  %v1003_v12 = vpack.c.bf16 %v653_v11, %v652_v10  ;;  %v654_v13 = vld [vmem:[#allocation10 + $0x30] sm:$0xff] }
  0x82   :  { %322 = vmatprep.mubr.f32.mxu1 %v1197_v0  ;;  %860 = vmatprep.mubr.msk.f32.mxu0 %vm1199_vm0, %v1197_v0 }
  0x83   :  { %1002 = vmatpush3.bf16.msra.mxu1 %v999_v9 }
  0x84   :  { %1004 = vmatprep.subr.bf16.mxu1 %v1003_v12 }
  0x85   :  { %323 = vmatmul.mubr.f32.gmra.mrb[4].mxu1 %v102_v14  ;;  %v655_v14 = vld [vmem:[#allocation10 + $0x38] sm:$0xff] }
  0x86   :  { %328 = vmatprep.mubr.f32.mxu1 %v1197_v0 }
  0x87   :  { %1006 = vmatpush3.bf16.msra.mxu1 %v1003_v12 }
  0x89   :  { %329 = vmatmul.mubr.f32.gmra.mrb[6].mxu1 %v103_v15  ;;  %v1007_v15 = vpack.c.bf16 %v655_v14, %v654_v13 }
  0x8b   :  { %1008 = vmatprep.subr.bf16.mxu1 %v1007_v15 }
  0x8c   :  { %1010 = vmatpush3.bf16.msra.mxu1 %v1007_v15 }
 0x150   :  { %v312_v22 = vpop.f32.mrb[0].mxu1 }
 0x151   :  { %v314_v24 = vpop.f32.mrb[1].mxu1  ;;  %v313_v28 = vadd.f32 %v312_v22, %v239_v23 }
 0x152   :  { %v315_v33 = vadd.f32 %v314_v24, %v243_v25 }
 0x154   :  { %v318_v26 = vpop.f32.mrb[2].mxu1  ;;  %v855_v27 = vpop.f32.mrb[0].mxu0 }
 0x155   :  { %v319_v29 = vadd.f32 %v318_v26, %v239_v23  ;;  %v320_v30 = vpop.f32.mrb[3].mxu1  ;;  %v193_v32 = vpop.f32.mrb[1].mxu0  ;;  %v1355_v49 = vadd.f32 %v855_v27, %v769_v31 }
 0x156   :  { %v321_v34 = vadd.f32 %v320_v30, %v243_v25  ;;  %v1344_v38 = vadd.f32 %v769_v31, %v193_v32  ;;  %v662_v31 = vld [vmem:[#allocation10 + $0x70] sm:$0xff]  ;;  %v663_v32 = vld [vmem:[#allocation10 + $0x78] sm:$0xff] }
 0x157   :  { %v984_v35 = vpack.c.bf16 %v319_v29, %v313_v28  ;;  %v336_v50 = vmul.f32 0.17677669, %v1355_v49  ;;  %v660_v28 = vld [vmem:[#allocation10 + $0x60] sm:$0xff]  ;;  %v661_v29 = vld [vmem:[#allocation10 + $0x68] sm:$0xff] }
 0x158   :  { %v990_v36 = vpack.c.bf16 %v321_v34, %v315_v33  ;;  %v324_v37 = vpop.f32.mrb[4].mxu1  ;;  %v335_v41 = vmul.f32 0.17677669, %v1344_v38  ;;  %v1019_v30 = vpack.c.bf16 %v661_v29, %v660_v28  ;;  %v1023_v33 = vpack.c.bf16 %v663_v32, %v662_v31 }
 0x159   :  { %v326_v39 = vpop.f32.mrb[5].mxu1  ;;  %985 = vmatpush3.bf16.xpose.msra.mxu0 %v984_v35  ;;  %v325_v43 = vadd.f32 %v324_v37, %v239_v23 }
 0x15a   :  { %v1346_v40 = vadd.f32 %v326_v39, %v243_v25  ;;  %986 = vmatprep.subr.bf16.mxu0 %v1198_v16 }
 0x15c   :  { %v330_v42 = vpop.f32.mrb[6].mxu1 }
 0x15d   :  { %v331_v44 = vadd.f32 %v330_v42, %v239_v23  ;;  %v332_v45 = vpop.f32.mrb[7].mxu1 }
 0x15e   :  { %v1349_v46 = vadd.f32 %v332_v45, %v243_v25 }
 0x15f   :  { %v987_v47 = vpack.c.bf16 %v331_v44, %v325_v43 }
 0x160   :  { %v993_v48 = vpack.c.bf16 %v1349_v46, %v1346_v40  ;;  %861 = vmatmul.mubr.f32.vlgmr.msra.gmra.mrb[2].mxu0 %v335_v41  ;;  %v772_v40 = vld [vmem:[%s1398_s7] ss:$0 sm:$0xff] }
 0x161   :  { %988 = vmatpush3.bf16.xpose.msra.mxu0 %v987_v47  ;;  %867 = vmatprep.mubr.msk.f32.mxu0 %vm1199_vm0, %v1197_v0 }
 0x162   :  { %989 = vmatprep.subr.bf16.mxu0 %v1198_v16 }
 0x168   :  { %868 = vmatmul.mubr.f32.vlgmr.msra.gmra.mrb[4].mxu0 %v336_v50 }
 0x169   :  { %991 = vmatpush3.bf16.msra.mxu0 %v990_v36  ;;  %874 = vmatprep.mubr.msk.f32.mxu0 %vm1199_vm0, %v1197_v0 }
 0x16a   :  { %992 = vmatprep.subr.bf16.mxu0 %v1198_v16  ;;  %v656_v16 = vld [vmem:[#allocation10 + $0x40] sm:$0xff] }
 0x16b   :  { %v1011_v18 = vpack.c.bf16 %v657_v17, %v656_v16 }
 0x16d   :  { %1012 = vmatprep.subr.bf16.mxu1 %v1011_v18 }
 0x16e   :  { %1014 = vmatpush3.bf16.msra.mxu1 %v1011_v18 }
 0x16f   :  { %1016 = vmatprep.subr.bf16.mxu1 %v1015_v21 }
 0x172   :  { %1018 = vmatpush3.bf16.msra.mxu1 %v1015_v21 }
 0x173   :  { %1020 = vmatprep.subr.bf16.mxu1 %v1019_v30 }
 0x176   :  { %1022 = vmatpush3.bf16.msra.mxu1 %v1019_v30 }
 0x177   :  { %1024 = vmatprep.subr.bf16.mxu1 %v1023_v33 }
 0x17a   :  { %1026 = vmatpush3.bf16.msra.mxu1 %v1023_v33 }
 0x233   :  { %v403_v51 = vpop.f32.mrb[2].mxu0 }
 0x234   :  { %v862_v52 = vpop.f32.mrb[3].mxu0  ;;  %v478_v53 = vsel %vm477_vm1, %v403_v51, -inf }
 0x235   :  { %479 = vmax.xlane.f32.xlu0 %v478_v53 }
 0x23b   :  { %v473_v54 = vpop.f32.mrb[4].mxu0 }
 0x23c   :  { %v869_v55 = vpop.f32.mrb[5].mxu0  ;;  %v481_v56 = vsel %vm477_vm1, %v473_v54, -inf }
 0x23d   :  { %482 = vmax.xlane.f32.xlu0 %v481_v56 }
 0x2c2   :  { %v480_v57 = vpop.xlane.xlu0 %479 }
 0x2c3   :  { %v484_v58 = vsub.f32 %v403_v51, %v480_v57 }
 0x2c5   :  { %v486_v59 = vmul.f32 1.442695, %v484_v58 }
 0x2c7   :  { %1040 = vpow2.f32 %v486_v59 }
 0x2ca   :  { %v483_v60 = vpop.xlane.xlu0 %482 }
 0x2cb   :  { %v485_v61 = vsub.f32 %v473_v54, %v483_v60 }
 0x2cd   :  { %v488_v62 = vmul.f32 1.442695, %v485_v61 }
 0x2cf   :  { %1042 = vpow2.f32 %v488_v62 }
 0x2d1   :  { %v1041_v63 = vpop.eup %1040 }
 0x2d2   :  { %v490_v1 = vsel %vm477_vm1, %v1041_v63, 0.0 }
 0x2d3   :  { %491 = vadd.xlane.f32.xlu1 %v490_v1 }
 0x2d9   :  { %v1043_v2 = vpop.eup %1042 }
 0x2da   :  { %v493_v3 = vsel %vm477_vm1, %v1043_v2, 0.0 }
 0x2db   :  { %494 = vadd.xlane.f32.xlu1 %v493_v3 }
 0x360   :  { %v492_v22 = vpop.xlane.xlu1 %491 }
 0x361   :  { %1044 = vrcp.f32 %v492_v22 }
 0x368   :  { %v495_v23 = vpop.xlane.xlu1 %494 }
 0x369   :  { %1046 = vrcp.f32 %v495_v23 }
 0x36b   :  { %v1045_v24 = vpop.eup %1044 }
 0x36c   :  { %v497_v25 = vmul.f32 %v1045_v24, %v1041_v63 }
 0x36e   :  { %875 = vmatmul.mubr.msk.f32.vlgmr.msra.gmra.mrb[6].mxu0 %vm477_vm1, %v497_v25 }
 0x36f   :  { %994 = vmatpush3.bf16.msra.mxu0 %v993_v48  ;;  %881 = vmatprep.mubr.msk.f32.mxu0 %vm1199_vm0, %v1197_v0 }
 0x373   :  { %v1047_v26 = vpop.eup %1046 }
 0x374   :  { %v499_v27 = vmul.f32 %v1047_v26, %v1043_v2 }
 0x376   :  { %882 = vmatmul.mubr.msk.f32.vlgmr.msra.gmra.mrb[8].mxu0 %vm477_vm1, %v499_v27 }
 0x441   :  { %v569_v34 = vpop.f32.mrb[6].mxu0 }
 0x442   :  { %v646_v35 = vadd.f32 %v569_v34, %v1344_v38  ;;  %v876_v36 = vpop.f32.mrb[7].mxu0 }
 0x444   :  { %916 = vmatprep.mubr.f32.mxu1 %v646_v35 }
 0x449   :  { %v642_v0 = vpop.f32.mrb[8].mxu0 }
 0x44a   :  { %v647_v37 = vadd.f32 %v642_v0, %v1355_v49  ;;  %v883_v39 = vpop.f32.mrb[9].mxu0 }
 0x44c   :  { %917 = vmatmul.mubr.f32.vlgmr.msra.gmra.mrb[8].mxu1 %v647_v37 }
 0x51f   :  { %v918_v41 = vpop.f32.mrb[8].mxu1 }
 0x520   :  { %v743_v42 = vadd.f32 %v918_v41, %v772_v40  ;;  %v737_v43 = vpop.f32.mrb[9].mxu1 }
 0x521   :  { %v738_v44 = vadd.f32 %v772_v40, %v737_v43 }
 0x522   :  { %v747_v45 = vmax.f32 %v743_v42, 0.0 }
 0x523   :  { %v746_v46 = vmax.f32 %v738_v44, 0.0 }
 0x524   :  { %749 = vst [vmem:[#allocation11 + $0x8] sm:$0xff] %v747_v45 }
 0x525   :  { %748 = vst [vmem:[#allocation11] sm:$0xff] %v746_v46 }
 0x526   :  { %1169 = shalt.err (!%p1166_p2)
}
 0x527   :  { %s1170_s28 = scalar_lea.hbm %s1399_s8, 256 }
 0x528   :  { %p1171_p3 = scmp.ne.s32.totalorder %s1399_s8, %s1170_s28  ;;  %p1174_p4 = scmp.lt.u32.totalorder %s1170_s28, %s1399_s8 }
 0x52a   :  { %p1176_p5 = pnand %p1174_p4, %p1171_p3 }
 0x52c   :  { %1179 = shalt.err (!%p1176_p5)
}
 0x52d   :  { %761 = dma.vmem_to_hbm [thread:$0]  %s756_s27, 256, %s1399_s8, [#allocation4], %s1190_s17, %s1190_s17, %s1191_s18  }
 0x52e   :  { %1186 = dma.done.wait [#allocation4], 256  }
 0x52f   :  { %1187 = vsyncadd [#allocation4], 4294967040 }
 0x530   :  { %765 = vsyncpa [#allocation3], 1 }
 0x531   :  { %766 = vsyncpa [#allocation6], 1 }
 0x532   :  { %767 = vsyncpa [#allocation9], 1 }
 0x533   :  { %768 = vsyncpa [#allocation4], 1 }

// kernel: tpu_custom_call.1
= control target key start
LH: loop header
LB: loop body
LE: loop exit
PB: predicated region body
PF: predicated region fallthrough
CT: control target
= control target key end

     0   :  { %13 = vsyncpa [#allocation3], 0  ;;  %s1391_s0 = inlined_call_operand.hbm [shape: f32[2,8,128], index: 0, kind: input, shape index: {}]   ;;  %s1392_s1 = inlined_call_operand.hbm [shape: f32[2,16,128], index: 1, kind: input, shape index: {}]   ;;  %s1393_s2 = inlined_call_operand.hbm [shape: f32[128,128], index: 2, kind: input, shape index: {}]   ;;  %s1394_s3 = inlined_call_operand.vmem [shape: f32[1,128], index: 3, kind: input, shape index: {}]   ;;  %s1395_s4 = inlined_call_operand.hbm [shape: f32[128,256], index: 4, kind: input, shape index: {}]   ;;  %s1396_s5 = inlined_call_operand.vmem [shape: f32[1,256], index: 5, kind: input, shape index: {}]   ;;  %s1397_s6 = inlined_call_operand.hbm [shape: f32[128,128], index: 6, kind: input, shape index: {}]   ;;  %s1398_s7 = inlined_call_operand.vmem [shape: f32[1,128], index: 7, kind: input, shape index: {}]   ;;  %s1399_s8 = inlined_call_operand.hbm [shape: f32[2,8,128], index: 8, kind: output, shape index: {}]  }
   0x1   :  { %14 = vsyncpa [#allocation6], 0 }
   0x2   :  { %15 = vsyncpa [#allocation9], 0 }
   0x3   :  { %16 = vsyncpa [#allocation4], 0  ;;  %s1188_s27 = smov [#allocation5]   ;;  %s1189_s29 = smov [#allocation8]  }
   0x4   :  { %s34_s28 = sshll.u32 %s1188_s27, 4  ;;  %s60_s30 = sshll.u32 %s1189_s29, 4  ;;  %s35_s28 = int_to_ptr.vmem [resolvable:$true] %s34_s28  ;;  %s1246_s30 = int_to_ptr.vmem [resolvable:$true] %s60_s30 }
   0x5   :  { %s1048_s11 = scalar_lea.hbm %s1392_s1, 512 }
   0x6   :  { %p1049_p0 = scmp.ne.s32.totalorder %s1392_s1, %s1048_s11  ;;  %p1052_p1 = scmp.lt.u32.totalorder %s1048_s11, %s1392_s1 }
   0x8   :  { %p1054_p2 = pnand %p1052_p1, %p1049_p0 }
   0xa   :  { %1057 = shalt.err (!%p1054_p2)
}
   0xb   :  { %s1058_s16 = scalar_lea.vmem %s35_s28, 512  ;;  %p1063_p4 = scmp.lt.s32.totalorder %s35_s28, %s35_s28 }
   0xc   :  { %p1059_p3 = scmp.ne.s32.totalorder %s35_s28, %s1058_s16  ;;  %p1064_p5 = scmp.lt.s32.totalorder %s1058_s16, %s1058_s16 }
   0xe   :  { %p1065_p6 = por %p1064_p5, %p1063_p4 }
  0x10   :  { %p1066_p7 = pnand %p1065_p6, %p1059_p3 }
  0x12   :  { %1069 = shalt.err (!%p1066_p7)
}
  0x13   :  { %s1190_s17 = smov 128   ;;  %s1191_s18 = smov 8  }
  0x14   :  { %40 = dma.hbm_to_vmem [thread:$0]  %s1392_s1, 512, %s35_s28, [#allocation6], %s1190_s17, %s1190_s17, %s1191_s18  }
  0x15   :  { %s1070_s23 = scalar_lea.hbm %s1395_s4, 4096 }
  0x16   :  { %p1071_p8 = scmp.ne.s32.totalorder %s1395_s4, %s1070_s23  ;;  %p1074_p9 = scmp.lt.u32.totalorder %s1070_s23, %s1395_s4 }
  0x18   :  { %p1076_p10 = pnand %p1074_p9, %p1071_p8 }
  0x1a   :  { %1079 = shalt.err (!%p1076_p10)
}
  0x1b   :  { %s1080_s29 = scalar_lea.vmem %s1246_s30, 4096  ;;  %p1085_p12 = scmp.lt.s32.totalorder %s1246_s30, %s1246_s30 }
  0x1c   :  { %p1081_p11 = scmp.ne.s32.totalorder %s1246_s30, %s1080_s29  ;;  %p1086_p13 = scmp.lt.s32.totalorder %s1080_s29, %s1080_s29 }
  0x1e   :  { %p1087_p0 = por %p1086_p13, %p1085_p12 }
  0x20   :  { %p1088_p1 = pnand %p1087_p0, %p1081_p11 }
  0x22   :  { %1091 = shalt.err (!%p1088_p1)
}
  0x23   :  { %s1192_s1 = smov 256   ;;  %s1193_s28 = smov 16  }
  0x24   :  { %66 = dma.hbm_to_vmem [thread:$0]  %s1395_s4, 4096, %s1246_s30, [#allocation9], %s1192_s1, %s1192_s1, %s1193_s28  }
  0x25   :  { %s1194_s11 = smov [#allocation2]   ;;  %s1195_s13 = smov [#allocation7]  }
  0x26   :  { %s22_s12 = sshll.u32 %s1194_s11, 4  ;;  %s46_s14 = sshll.u32 %s1195_s13, 4  ;;  %s23_s12 = int_to_ptr.vmem [resolvable:$true] %s22_s12  ;;  %s1280_s14 = int_to_ptr.vmem [resolvable:$true] %s46_s14 }
  0x27   :  { %s1092_s19 = scalar_lea.hbm %s1391_s0, 256 }
  0x28   :  { %p1093_p2 = scmp.ne.s32.totalorder %s1391_s0, %s1092_s19  ;;  %p1096_p3 = scmp.lt.u32.totalorder %s1092_s19, %s1391_s0 }
  0x2a   :  { %p1098_p4 = pnand %p1096_p3, %p1093_p2 }
  0x2c   :  { %1101 = shalt.err (!%p1098_p4)
}
  0x2d   :  { %s1102_s4 = scalar_lea.vmem %s23_s12, 256  ;;  %p1107_p6 = scmp.lt.s32.totalorder %s23_s12, %s23_s12 }
  0x2e   :  { %p1103_p5 = scmp.ne.s32.totalorder %s23_s12, %s1102_s4  ;;  %p1108_p7 = scmp.lt.s32.totalorder %s1102_s4, %s1102_s4 }
  0x30   :  { %p1109_p8 = por %p1108_p7, %p1107_p6 }
  0x32   :  { %p1110_p9 = pnand %p1109_p8, %p1103_p5 }
  0x34   :  { %1113 = shalt.err (!%p1110_p9)
}
  0x35   :  { %28 = dma.hbm_to_vmem [thread:$0]  %s1391_s0, 256, %s23_s12, [#allocation3], %s1190_s17, %s1190_s17, %s1191_s18  }
  0x36   :  { %s1114_s27 = scalar_lea.hbm %s1393_s2, 2048 }
  0x37   :  { %p1115_p10 = scmp.ne.s32.totalorder %s1393_s2, %s1114_s27  ;;  %p1118_p11 = scmp.lt.u32.totalorder %s1114_s27, %s1393_s2 }
  0x39   :  { %p1120_p12 = pnand %p1118_p11, %p1115_p10 }
  0x3b   :  { %1123 = shalt.err (!%p1120_p12)
}
  0x3c   :  { %s1124_s10 = scalar_lea.vmem %s1280_s14, 2048  ;;  %p1129_p0 = scmp.lt.s32.totalorder %s1280_s14, %s1280_s14 }
  0x3d   :  { %p1125_p13 = scmp.ne.s32.totalorder %s1280_s14, %s1124_s10  ;;  %p1130_p1 = scmp.lt.s32.totalorder %s1124_s10, %s1124_s10 }
  0x3f   :  { %p1131_p2 = por %p1130_p1, %p1129_p0 }
  0x41   :  { %p1132_p3 = pnand %p1131_p2, %p1125_p13 }
  0x43   :  { %1135 = shalt.err (!%p1132_p3)
}
  0x44   :  { %52 = dma.hbm_to_vmem [thread:$0]  %s1393_s2, 2048, %s1280_s14, [#allocation6], %s1190_s17, %s1190_s17, %s1191_s18  }
  0x45   :  { %s1196_s12 = smov [#allocation10]   ;;  %s1136_s19 = scalar_lea.hbm %s1397_s6, 2048 }
  0x46   :  { %s74_s13 = sshll.u32 %s1196_s12, 4  ;;  %p1137_p4 = scmp.ne.s32.totalorder %s1397_s6, %s1136_s19  ;;  %s75_s13 = int_to_ptr.vmem [resolvable:$true] %s74_s13 }
  0x47   :  { %p1140_p5 = scmp.lt.u32.totalorder %s1136_s19, %s1397_s6 }
  0x49   :  { %p1142_p6 = pnand %p1140_p5, %p1137_p4 }
  0x4b   :  { %1145 = shalt.err (!%p1142_p6)
}
  0x4c   :  { %s1146_s4 = scalar_lea.vmem %s75_s13, 2048  ;;  %p1151_p8 = scmp.lt.s32.totalorder %s75_s13, %s75_s13 }
  0x4d   :  { %p1147_p7 = scmp.ne.s32.totalorder %s75_s13, %s1146_s4  ;;  %p1152_p9 = scmp.lt.s32.totalorder %s1146_s4, %s1146_s4 }
  0x4f   :  { %p1153_p10 = por %p1152_p9, %p1151_p8 }
  0x51   :  { %p1154_p11 = pnand %p1153_p10, %p1147_p7 }
  0x53   :  { %1157 = shalt.err (!%p1154_p11)
}
  0x54   :  { %80 = dma.hbm_to_vmem [thread:$0]  %s1397_s6, 2048, %s75_s13, [#allocation9], %s1190_s17, %s1190_s17, %s1191_s18  }
  0x55   :  { %1180 = dma.done.wait [#allocation3], 256  }
  0x56   :  { %1181 = vsyncadd [#allocation3], 4294967040 }
  0x57   :  { %1182 = dma.done.wait [#allocation6], 2560  }
  0x58   :  { %1183 = vsyncadd [#allocation6], 4294964736 }
  0x59   :  { %1184 = dma.done.wait [#allocation9], 6144  }
  0x5a   :  { %1185 = vsyncadd [#allocation9], 4294961152  ;;  %v1197_v0 = vmov 0.0   ;;  %v203_v1 = vld [vmem:[#allocation8 + $0x8] sm:$0xff]  ;;  %v205_v2 = vld [vmem:[#allocation8 + $0x18] sm:$0xff]  ;;  %vm1199_vm0 = vmmov 0  }
  0x5b   :  { %310 = vmatprep.mubr.f32.mxu1 %v1197_v0  ;;  %v202_v3 = vld [vmem:[#allocation8] sm:$0xff]  ;;  %v951_v4 = vpack.c.bf16 %v205_v2, %v203_v1  ;;  %v204_v5 = vld [vmem:[#allocation8 + $0x10] sm:$0xff]  ;;  %v207_v6 = vld [vmem:[#allocation8 + $0x28] sm:$0xff]  ;;  %vm477_vm1 = vcmask 130048   ;;  %s1200_s26 = smov [#allocation11]  }
  0x5c   :  { %v209_v7 = vld [vmem:[#allocation8 + $0x38] sm:$0xff]  ;;  %v953_v8 = vpack.c.bf16 %v204_v5, %v202_v3  ;;  %v206_v10 = vld [vmem:[#allocation8 + $0x20] sm:$0xff]  ;;  %v208_v11 = vld [vmem:[#allocation8 + $0x30] sm:$0xff]  ;;  %s755_s27 = sshll.u32 %s1200_s26, 4  ;;  %s756_s27 = int_to_ptr.vmem [resolvable:$true] %s755_s27 }
  0x5d   :  { %v955_v9 = vpack.c.bf16 %v209_v7, %v207_v6  ;;  %v211_v12 = vld [vmem:[#allocation8 + $0x48] sm:$0xff]  ;;  %952 = vmatprep.subr.bf16.mxu1 %v951_v4  ;;  %v213_v13 = vld [vmem:[#allocation8 + $0x58] sm:$0xff]  ;;  %v957_v14 = vpack.c.bf16 %v208_v11, %v206_v10  ;;  %v104_v15 = vld [vmem:[#allocation7] sm:$0xff]  ;;  %s1158_s29 = scalar_lea.vmem %s756_s27, 256  ;;  %p1163_p13 = scmp.lt.s32.totalorder %s756_s27, %s756_s27 }
  0x5e   :  { %954 = vmatpush1.bf16.msra.mxu1 %v953_v8  ;;  %v105_v16 = vld [vmem:[#allocation7 + $0x8] sm:$0xff]  ;;  %v959_v17 = vpack.c.bf16 %v213_v13, %v211_v12  ;;  %v210_v18 = vld [vmem:[#allocation8 + $0x40] sm:$0xff]  ;;  %v212_v19 = vld [vmem:[#allocation8 + $0x50] sm:$0xff]  ;;  %p1159_p12 = scmp.ne.s32.totalorder %s756_s27, %s1158_s29  ;;  %p1164_p0 = scmp.lt.s32.totalorder %s1158_s29, %s1158_s29 }
  0x5f   :  { %956 = vmatprep.subr.bf16.mxu1 %v955_v9  ;;  %v919_v20 = vpack.c.bf16 %v105_v16, %v104_v15  ;;  %v215_v21 = vld [vmem:[#allocation8 + $0x68] sm:$0xff]  ;;  %v217_v22 = vld [vmem:[#allocation8 + $0x78] sm:$0xff]  ;;  %v106_v23 = vld [vmem:[#allocation7 + $0x10] sm:$0xff]  ;;  %v961_v26 = vpack.c.bf16 %v212_v19, %v210_v18  ;;  %v1198_v16 = vmov 0.0|0.0  }
  0x60   :  { %v107_v24 = vld [vmem:[#allocation7 + $0x18] sm:$0xff]  ;;  %v108_v27 = vld [vmem:[#allocation7 + $0x20] sm:$0xff]  ;;  %v109_v28 = vld [vmem:[#allocation7 + $0x28] sm:$0xff]  ;;  %v963_v29 = vpack.c.bf16 %v217_v22, %v215_v21  ;;  %p1165_p1 = por %p1164_p0, %p1163_p13 }
  0x61   :  { %920 = vmatprep.subr.bf16.mxu0 %v919_v20  ;;  %v923_v25 = vpack.c.bf16 %v107_v24, %v106_v23  ;;  %v214_v30 = vld [vmem:[#allocation8 + $0x60] sm:$0xff]  ;;  %v216_v31 = vld [vmem:[#allocation8 + $0x70] sm:$0xff]  ;;  %v219_v32 = vld [vmem:[#allocation8 + $0x88] sm:$0xff]  ;;  %v927_v33 = vpack.c.bf16 %v109_v28, %v108_v27 }
  0x62   :  { %958 = vmatpush1.bf16.msra.mxu1 %v957_v14  ;;  %922 = vmatpush3.bf16.msra.mxu0 %v919_v20  ;;  %v221_v34 = vld [vmem:[#allocation8 + $0x98] sm:$0xff]  ;;  %v110_v35 = vld [vmem:[#allocation7 + $0x30] sm:$0xff]  ;;  %v965_v37 = vpack.c.bf16 %v216_v31, %v214_v30  ;;  %v218_v39 = vld [vmem:[#allocation8 + $0x80] sm:$0xff]  ;;  %p1166_p2 = pnand %p1165_p1, %p1159_p12 }
  0x63   :  { %960 = vmatprep.subr.bf16.mxu1 %v959_v17  ;;  %924 = vmatprep.subr.bf16.mxu0 %v923_v25  ;;  %v111_v36 = vld [vmem:[#allocation7 + $0x38] sm:$0xff]  ;;  %v967_v38 = vpack.c.bf16 %v221_v34, %v219_v32  ;;  %v220_v40 = vld [vmem:[#allocation8 + $0x90] sm:$0xff]  ;;  %v223_v41 = vld [vmem:[#allocation8 + $0xa8] sm:$0xff]  ;;  %v236_v17 = vlaneseq }
  0x64   :  { %v931_v42 = vpack.c.bf16 %v111_v36, %v110_v35  ;;  %v225_v43 = vld [vmem:[#allocation8 + $0xb8] sm:$0xff]  ;;  %v112_v44 = vld [vmem:[#allocation7 + $0x40] sm:$0xff]  ;;  %v113_v45 = vld [vmem:[#allocation7 + $0x48] sm:$0xff]  ;;  %v969_v46 = vpack.c.bf16 %v220_v40, %v218_v39 }
  0x65   :  { %v222_v47 = vld [vmem:[#allocation8 + $0xa0] sm:$0xff]  ;;  %v971_v48 = vpack.c.bf16 %v225_v43, %v223_v41  ;;  %v224_v49 = vld [vmem:[#allocation8 + $0xb0] sm:$0xff]  ;;  %v227_v50 = vld [vmem:[#allocation8 + $0xc8] sm:$0xff]  ;;  %v935_v51 = vpack.c.bf16 %v113_v45, %v112_v44  ;;  %v237_v18 = vshrl.u32 %v236_v17, 7 }
  0x66   :  { %962 = vmatpush1.bf16.msra.mxu1 %v961_v26  ;;  %926 = vmatpush3.bf16.msra.mxu0 %v923_v25  ;;  %v98_v52 = vld [vmem:[#allocation2] sm:$0xff]  ;;  %v229_v53 = vld [vmem:[#allocation8 + $0xd8] sm:$0xff]  ;;  %v973_v56 = vpack.c.bf16 %v224_v49, %v222_v47  ;;  %v226_v58 = vld [vmem:[#allocation8 + $0xc0] sm:$0xff] }
  0x67   :  { %964 = vmatprep.subr.bf16.mxu1 %v963_v29  ;;  %928 = vmatprep.subr.bf16.mxu0 %v927_v33  ;;  %v114_v54 = vld [vmem:[#allocation7 + $0x50] sm:$0xff]  ;;  %v115_v55 = vld [vmem:[#allocation7 + $0x58] sm:$0xff]  ;;  %v975_v57 = vpack.c.bf16 %v229_v53, %v227_v50  ;;  %v231_v60 = vld [vmem:[#allocation8 + $0xe8] sm:$0xff]  ;;  %v238_v19 = vsub.s32 0, %v237_v18  ;;  %v242_v21 = vsub.s32 1, %v237_v18 }
  0x68   :  { %853 = vmatprep.mubr.f32.mxu0 %v98_v52  ;;  %v228_v59 = vld [vmem:[#allocation8 + $0xd0] sm:$0xff]  ;;  %v939_v61 = vpack.c.bf16 %v115_v55, %v114_v54  ;;  %v233_v62 = vld [vmem:[#allocation8 + $0xf8] sm:$0xff]  ;;  %v116_v63 = vld [vmem:[#allocation7 + $0x60] sm:$0xff] }
  0x69   :  { %v117_v1 = vld [vmem:[#allocation7 + $0x68] sm:$0xff]  ;;  %v977_v2 = vpack.c.bf16 %v228_v59, %v226_v58  ;;  %v979_v3 = vpack.c.bf16 %v233_v62, %v231_v60  ;;  %v230_v4 = vld [vmem:[#allocation8 + $0xe0] sm:$0xff]  ;;  %v232_v5 = vld [vmem:[#allocation8 + $0xf0] sm:$0xff] }
  0x6a   :  { %966 = vmatpush1.bf16.msra.mxu1 %v965_v37  ;;  %930 = vmatpush3.bf16.msra.mxu0 %v927_v33  ;;  %v943_v6 = vpack.c.bf16 %v117_v1, %v116_v63  ;;  %v118_v7 = vld [vmem:[#allocation7 + $0x70] sm:$0xff]  ;;  %v119_v8 = vld [vmem:[#allocation7 + $0x78] sm:$0xff]  ;;  %v981_v9 = vpack.c.bf16 %v232_v5, %v230_v4  ;;  %v100_v11 = vld [vmem:[#allocation5] sm:$0xff] }
  0x6b   :  { %968 = vmatprep.subr.bf16.mxu1 %v967_v38  ;;  %932 = vmatprep.subr.bf16.mxu0 %v931_v42  ;;  %v947_v10 = vpack.c.bf16 %v119_v8, %v118_v7  ;;  %v101_v12 = vld [vmem:[#allocation5 + $0x8] sm:$0xff]  ;;  %v99_v13 = vld [vmem:[#allocation2 + $0x8] sm:$0xff]  ;;  %v102_v14 = vld [vmem:[#allocation5 + $0x10] sm:$0xff] }
  0x6c   :  { %v103_v15 = vld [vmem:[#allocation5 + $0x18] sm:$0xff]  ;;  %v234_v20 = vld [vmem:[%s1396_s5] sm:$0x3]  ;;  %v648_v4 = vld [vmem:[#allocation10] sm:$0xff] }
  0x6d   :  { %v239_v23 = vrot.slane %v234_v20, %v238_v19  ;;  %v243_v25 = vrot.slane %v234_v20, %v242_v21  ;;  %v769_v31 = vld [vmem:[%s1394_s3] ss:$0 sm:$0xff]  ;;  %v649_v5 = vld [vmem:[#allocation10 + $0x8] sm:$0xff]  ;;  %v651_v8 = vld [vmem:[#allocation10 + $0x18] sm:$0xff] }
  0x6e   :  { %970 = vmatpush1.bf16.msra.mxu1 %v969_v46  ;;  %934 = vmatpush3.bf16.msra.mxu0 %v931_v42  ;;  %v995_v7 = vpack.c.bf16 %v649_v5, %v648_v4  ;;  %v657_v17 = vld [vmem:[#allocation10 + $0x48] sm:$0xff]  ;;  %v658_v19 = vld [vmem:[#allocation10 + $0x50] sm:$0xff]  ;;  %v659_v20 = vld [vmem:[#allocation10 + $0x58] sm:$0xff] }
  0x6f   :  { %972 = vmatprep.subr.bf16.mxu1 %v971_v48  ;;  %936 = vmatprep.subr.bf16.mxu0 %v935_v51  ;;  %v1015_v21 = vpack.c.bf16 %v659_v20, %v658_v19 }
  0x72   :  { %974 = vmatpush1.bf16.msra.mxu1 %v973_v56  ;;  %938 = vmatpush3.bf16.msra.mxu0 %v935_v51 }
  0x73   :  { %976 = vmatprep.subr.bf16.mxu1 %v975_v57  ;;  %940 = vmatprep.subr.bf16.mxu0 %v939_v61 }
  0x76   :  { %978 = vmatpush1.bf16.msra.mxu1 %v977_v2  ;;  %942 = vmatpush3.bf16.msra.mxu0 %v939_v61 }
  0x77   :  { %980 = vmatprep.subr.bf16.mxu1 %v979_v3  ;;  %944 = vmatprep.subr.bf16.mxu0 %v943_v6 }
  0x7a   :  { %982 = vmatpush1.bf16.msra.mxu1 %v981_v9  ;;  %946 = vmatpush3.bf16.msra.mxu0 %v943_v6  ;;  %v650_v6 = vld [vmem:[#allocation10 + $0x10] sm:$0xff] }
  0x7b   :  { %948 = vmatprep.subr.bf16.mxu0 %v947_v10  ;;  %v999_v9 = vpack.c.bf16 %v651_v8, %v650_v6  ;;  %996 = vmatprep.subr.bf16.mxu1 %v995_v7 }
  0x7d   :  { %311 = vmatmul.mubr.f32.vlgmr.msra.gmra.mrb[0].mxu1 %v100_v11  ;;  %v653_v11 = vld [vmem:[#allocation10 + $0x28] sm:$0xff] }
  0x7e   :  { %316 = vmatprep.mubr.f32.mxu1 %v1197_v0  ;;  %950 = vmatpush3.bf16.msra.mxu0 %v947_v10  ;;  %v652_v10 = vld [vmem:[#allocation10 + $0x20] sm:$0xff] }
  0x7f   :  { %983 = vmatprep.subr.bf16.mxu0 %v1198_v16  ;;  %998 = vmatpush3.bf16.msra.mxu1 %v995_v7 }
  0x80   :  { %1000 = vmatprep.subr.bf16.mxu1 %v999_v9 }
  0x81   :  { %317 = vmatmul.mubr.f32.gmra.mrb[2].mxu1 %v101_v12  ;;  %854 = vmatmul.mubr.f32.vlgmr.msra.gmra.mrb[0].mxu0 %v99_v13  ;;  %v1003_v12 = vpack.c.bf16 %v653_v11, %v652_v10  ;;  %v654_v13 = vld [vmem:[#allocation10 + $0x30] sm:$0xff] }
  0x82   :  { %322 = vmatprep.mubr.f32.mxu1 %v1197_v0  ;;  %860 = vmatprep.mubr.msk.f32.mxu0 %vm1199_vm0, %v1197_v0 }
  0x83   :  { %1002 = vmatpush3.bf16.msra.mxu1 %v999_v9 }
  0x84   :  { %1004 = vmatprep.subr.bf16.mxu1 %v1003_v12 }
  0x85   :  { %323 = vmatmul.mubr.f32.gmra.mrb[4].mxu1 %v102_v14  ;;  %v655_v14 = vld [vmem:[#allocation10 + $0x38] sm:$0xff] }
  0x86   :  { %328 = vmatprep.mubr.f32.mxu1 %v1197_v0 }
  0x87   :  { %1006 = vmatpush3.bf16.msra.mxu1 %v1003_v12 }
  0x89   :  { %329 = vmatmul.mubr.f32.gmra.mrb[6].mxu1 %v103_v15  ;;  %v1007_v15 = vpack.c.bf16 %v655_v14, %v654_v13 }
  0x8b   :  { %1008 = vmatprep.subr.bf16.mxu1 %v1007_v15 }
  0x8c   :  { %1010 = vmatpush3.bf16.msra.mxu1 %v1007_v15 }
 0x150   :  { %v312_v22 = vpop.f32.mrb[0].mxu1 }
 0x151   :  { %v314_v24 = vpop.f32.mrb[1].mxu1  ;;  %v313_v28 = vadd.f32 %v312_v22, %v239_v23 }
 0x152   :  { %v315_v33 = vadd.f32 %v314_v24, %v243_v25 }
 0x154   :  { %v318_v26 = vpop.f32.mrb[2].mxu1  ;;  %v855_v27 = vpop.f32.mrb[0].mxu0 }
 0x155   :  { %v319_v29 = vadd.f32 %v318_v26, %v239_v23  ;;  %v320_v30 = vpop.f32.mrb[3].mxu1  ;;  %v193_v32 = vpop.f32.mrb[1].mxu0  ;;  %v1355_v49 = vadd.f32 %v855_v27, %v769_v31 }
 0x156   :  { %v321_v34 = vadd.f32 %v320_v30, %v243_v25  ;;  %v1344_v38 = vadd.f32 %v769_v31, %v193_v32  ;;  %v662_v31 = vld [vmem:[#allocation10 + $0x70] sm:$0xff]  ;;  %v663_v32 = vld [vmem:[#allocation10 + $0x78] sm:$0xff] }
 0x157   :  { %v984_v35 = vpack.c.bf16 %v319_v29, %v313_v28  ;;  %v336_v50 = vmul.f32 0.17677669, %v1355_v49  ;;  %v660_v28 = vld [vmem:[#allocation10 + $0x60] sm:$0xff]  ;;  %v661_v29 = vld [vmem:[#allocation10 + $0x68] sm:$0xff] }
 0x158   :  { %v990_v36 = vpack.c.bf16 %v321_v34, %v315_v33  ;;  %v324_v37 = vpop.f32.mrb[4].mxu1  ;;  %v335_v41 = vmul.f32 0.17677669, %v1344_v38  ;;  %v1019_v30 = vpack.c.bf16 %v661_v29, %v660_v28  ;;  %v1023_v33 = vpack.c.bf16 %v663_v32, %v662_v31 }
 0x159   :  { %v326_v39 = vpop.f32.mrb[5].mxu1  ;;  %985 = vmatpush3.bf16.xpose.msra.mxu0 %v984_v35  ;;  %v325_v43 = vadd.f32 %v324_v37, %v239_v23 }
 0x15a   :  { %v1346_v40 = vadd.f32 %v326_v39, %v243_v25  ;;  %986 = vmatprep.subr.bf16.mxu0 %v1198_v16 }
 0x15c   :  { %v330_v42 = vpop.f32.mrb[6].mxu1 }
 0x15d   :  { %v331_v44 = vadd.f32 %v330_v42, %v239_v23  ;;  %v332_v45 = vpop.f32.mrb[7].mxu1 }
 0x15e   :  { %v1349_v46 = vadd.f32 %v332_v45, %v243_v25 }
 0x15f   :  { %v987_v47 = vpack.c.bf16 %v331_v44, %v325_v43 }
 0x160   :  { %v993_v48 = vpack.c.bf16 %v1349_v46, %v1346_v40  ;;  %861 = vmatmul.mubr.f32.vlgmr.msra.gmra.mrb[2].mxu0 %v335_v41  ;;  %v772_v40 = vld [vmem:[%s1398_s7] ss:$0 sm:$0xff] }
 0x161   :  { %988 = vmatpush3.bf16.xpose.msra.mxu0 %v987_v47  ;;  %867 = vmatprep.mubr.msk.f32.mxu0 %vm1199_vm0, %v1197_v0 }
 0x162   :  { %989 = vmatprep.subr.bf16.mxu0 %v1198_v16 }
 0x168   :  { %868 = vmatmul.mubr.f32.vlgmr.msra.gmra.mrb[4].mxu0 %v336_v50 }
 0x169   :  { %991 = vmatpush3.bf16.msra.mxu0 %v990_v36  ;;  %874 = vmatprep.mubr.msk.f32.mxu0 %vm1199_vm0, %v1197_v0 }
 0x16a   :  { %992 = vmatprep.subr.bf16.mxu0 %v1198_v16  ;;  %v656_v16 = vld [vmem:[#allocation10 + $0x40] sm:$0xff] }
 0x16b   :  { %v1011_v18 = vpack.c.bf16 %v657_v17, %v656_v16 }
 0x16d   :  { %1012 = vmatprep.subr.bf16.mxu1 %v1011_v18 }
 0x16e   :  { %1014 = vmatpush3.bf16.msra.mxu1 %v1011_v18 }
 0x16f   :  { %1016 = vmatprep.subr.bf16.mxu1 %v1015_v21 }
 0x172   :  { %1018 = vmatpush3.bf16.msra.mxu1 %v1015_v21 }
 0x173   :  { %1020 = vmatprep.subr.bf16.mxu1 %v1019_v30 }
 0x176   :  { %1022 = vmatpush3.bf16.msra.mxu1 %v1019_v30 }
 0x177   :  { %1024 = vmatprep.subr.bf16.mxu1 %v1023_v33 }
 0x17a   :  { %1026 = vmatpush3.bf16.msra.mxu1 %v1023_v33 }
 0x233   :  { %v403_v51 = vpop.f32.mrb[2].mxu0 }
 0x234   :  { %v862_v52 = vpop.f32.mrb[3].mxu0  ;;  %v478_v53 = vsel %vm477_vm1, %v403_v51, -inf }
 0x235   :  { %479 = vmax.xlane.f32.xlu0 %v478_v53 }
 0x23b   :  { %v473_v54 = vpop.f32.mrb[4].mxu0 }
 0x23c   :  { %v869_v55 = vpop.f32.mrb[5].mxu0  ;;  %v481_v56 = vsel %vm477_vm1, %v473_v54, -inf }
 0x23d   :  { %482 = vmax.xlane.f32.xlu0 %v481_v56 }
 0x2c2   :  { %v480_v57 = vpop.xlane.xlu0 %479 }
 0x2c3   :  { %v484_v58 = vsub.f32 %v403_v51, %v480_v57 }
 0x2c5   :  { %v486_v59 = vmul.f32 1.442695, %v484_v58 }
 0x2c7   :  { %1040 = vpow2.f32 %v486_v59 }
 0x2ca   :  { %v483_v60 = vpop.xlane.xlu0 %482 }
 0x2cb   :  { %v485_v61 = vsub.f32 %v473_v54, %v483_v60 }
 0x2cd   :  { %v488_v62 = vmul.f32 1.442695, %v485_v61 }
 0x2cf   :  { %1042 = vpow2.f32 %v488_v62 }
 0x2d1   :  { %v1041_v63 = vpop.eup %1040 }
 0x2d2   :  { %v490_v1 = vsel %vm477_vm1, %v1041_v63, 0.0 }
 0x2d3   :  { %491 = vadd.xlane.f32.xlu1 %v490_v1 }
 0x2d9   :  { %v1043_v2 = vpop.eup %1042 }
 0x2da   :  { %v493_v3 = vsel %vm477_vm1, %v1043_v2, 0.0 }
 0x2db   :  { %494 = vadd.xlane.f32.xlu1 %v493_v3 }
 0x360   :  { %v492_v22 = vpop.xlane.xlu1 %491 }
 0x361   :  { %1044 = vrcp.f32 %v492_v22 }
 0x368   :  { %v495_v23 = vpop.xlane.xlu1 %494 }
 0x369   :  { %1046 = vrcp.f32 %v495_v23 }
 0x36b   :  { %v1045_v24 = vpop.eup %1044 }
 0x36c   :  { %v497_v25 = vmul.f32 %v1045_v24, %v1041_v63 }
 0x36e   :  { %875 = vmatmul.mubr.msk.f32.vlgmr.msra.gmra.mrb[6].mxu0 %vm477_vm1, %v497_v25 }
 0x36f   :  { %994 = vmatpush3.bf16.msra.mxu0 %v993_v48  ;;  %881 = vmatprep.mubr.msk.f32.mxu0 %vm1199_vm0, %v1197_v0 }
 0x373   :  { %v1047_v26 = vpop.eup %1046 }
 0x374   :  { %v499_v27 = vmul.f32 %v1047_v26, %v1043_v2 }
 0x376   :  { %882 = vmatmul.mubr.msk.f32.vlgmr.msra.gmra.mrb[8].mxu0 %vm477_vm1, %v499_v27 }
 0x441   :  { %v569_v34 = vpop.f32.mrb[6].mxu0 }
 0x442   :  { %v646_v35 = vadd.f32 %v569_v34, %v1344_v38  ;;  %v876_v36 = vpop.f32.mrb[7].mxu0 }
 0x444   :  { %916 = vmatprep.mubr.f32.mxu1 %v646_v35 }
 0x449   :  { %v642_v0 = vpop.f32.mrb[8].mxu0 }
 0x44a   :  { %v647_v37 = vadd.f32 %v642_v0, %v1355_v49  ;;  %v883_v39 = vpop.f32.mrb[9].mxu0 }
 0x44c   :  { %917 = vmatmul.mubr.f32.vlgmr.msra.gmra.mrb[8].mxu1 %v647_v37 }
 0x51f   :  { %v918_v41 = vpop.f32.mrb[8].mxu1 }
 0x520   :  { %v743_v42 = vadd.f32 %v918_v41, %v772_v40  ;;  %v737_v43 = vpop.f32.mrb[9].mxu1 }
 0x521   :  { %v738_v44 = vadd.f32 %v772_v40, %v737_v43 }
 0x522   :  { %v747_v45 = vmax.f32 %v743_v42, 0.0 }
 0x523   :  { %v746_v46 = vmax.f32 %v738_v44, 0.0 }
 0x524   :  { %749 = vst [vmem:[#allocation11 + $0x8] sm:$0xff] %v747_v45 }
 0x525   :  { %748 = vst [vmem:[#allocation11] sm:$0xff] %v746_v46 }
 0x526   :  { %1169 = shalt.err (!%p1166_p2)
}
 0x527   :  { %s1170_s28 = scalar_lea.hbm %s1399_s8, 256 }
 0x528   :  { %p1171_p3 = scmp.ne.s32.totalorder %s1399_s8, %s1170_s28  ;;  %p1174_p4 = scmp.lt.u32.totalorder %s1170_s28, %s1399_s8 }
 0x52a   :  { %p1176_p5 = pnand %p1174_p4, %p1171_p3 }
 0x52c   :  { %1179 = shalt.err (!%p1176_p5)
}
 0x52d   :  { %761 = dma.vmem_to_hbm [thread:$0]  %s756_s27, 256, %s1399_s8, [#allocation4], %s1190_s17, %s1190_s17, %s1191_s18  }
 0x52e   :  { %1186 = dma.done.wait [#allocation4], 256  }
 0x52f   :  { %1187 = vsyncadd [#allocation4], 4294967040 }
 0x530   :  { %765 = vsyncpa [#allocation3], 1 }
 0x531   :  { %766 = vsyncpa [#allocation6], 1 }
 0x532   :  { %767 = vsyncpa [#allocation9], 1 }
 0x533   :  { %768 = vsyncpa [#allocation4], 1 }

</bundles_post_ra>
